<compile_context>
chip_gen: v7x
topology: tpu7x:2x2x1
jax: 0.10.0
libtpu: 0.0.40
codegen_flags: <defaults>
</compile_context>

<pallas_src>
import jax
import jax.numpy as jnp
from jax.experimental import pallas as pl
from jax.experimental.pallas import tpu as pltpu


# ----------------------------- static geometry ------------------------------
B, C, H, W = 2, 4, 16, 16                 # NCHW input shape of the module
CP = 8                                    # channels padded to one sublane tile
HP, WP = H + 2, W + 2                     # zero-padded ("same") spatial dims
NP = B * HP * WP                          # flattened padded grid = 648
NPW = 768                                 # lane axis padded to multiple of 128
NVALID = B * H * W                        # elements entering BN stats = 512
KTAPS = 9
EPS = 1e-5


def _tap_shift(k):
    dy, dx = k // 3, k % 3
    return (dy - 1) * WP + (dx - 1)       # lane shift of tap (dy, dx), |s| <= 19


# ----------------------------- in-kernel math --------------------------------
def _erf(x):
    # Abramowitz & Stegun 7.1.26; approx reciprocal (EUP) + one Newton step.
    ax = jnp.abs(x)
    d = 1.0 + 0.3275911 * ax
    t = pl.reciprocal(d, approx=True)
    t = t * (2.0 - d * t)                 # Newton step -> ~f32-exact 1/d
    poly = t * (0.254829592 + t * (-0.284496736 + t * (1.421413741
               + t * (-1.453152027 + t * 1.061405429))))
    y = 1.0 - poly * jnp.exp(-ax * ax)
    return jnp.where(x >= 0, y, -y)


def _gelu(x):
    # Exact (erf-based) GELU == torch.nn.GELU() default.
    return 0.5 * x * (1.0 + _erf(x * 0.7071067811865476))


# ------------------------------- fused kernel --------------------------------
def _residual_block_kernel(x_ref, mask_ref, w1_ref, g1_ref, b1_ref,
                           w2_ref, g2_ref, b2_ref, out_ref):
    # x_ref   : (CP, NPW)  flattened zero-padded grid on lanes, channels on
    #                      sublanes; rows C..CP-1 and lanes NP..NPW-1 are zero.
    # mask_ref: (CP, NPW)  1.0 on interior (valid) positions, else 0.0
    # w*_ref  : (9, CP, CP) per-tap conv weights [k, cout, cin] (zero-padded)
    # g*/b*   : (CP, 1)    BatchNorm affine params (zero-padded rows)
    # out_ref : (CP, NPW)  block output (interior lanes / first C rows valid)
    xv = x_ref[...]
    mask = mask_ref[...]
    inv_n = 1.0 / float(NVALID)

    def conv_bn(v, w_ref, g_ref, b_ref):
        # 3x3 "same" conv: 9 per-tap (CP,CP)@(CP,NPW) MXU matmuls; shifted tap
        # views are XLU lane rotations of the in-register activation.  Roll
        # wrap-around (|shift| <= 19) only touches ring/pad lanes, which are
        # never read back as valid outputs.
        acc = jnp.dot(w_ref[4], v, preferred_element_type=jnp.float32)  # center
        for k in range(KTAPS):
            if k == 4:
                continue
            shifted = pltpu.roll(v, (-_tap_shift(k)) % NPW, axis=1)
            acc = acc + jnp.dot(w_ref[k], shifted,
                                preferred_element_type=jnp.float32)
        # One-pass masked BatchNorm statistics (training mode, biased variance)
        # with the normalize+affine folded into a single scale/bias FMA.
        ym = acc * mask
        s1 = jnp.sum(ym, axis=1, keepdims=True)
        s2 = jnp.sum(ym * acc, axis=1, keepdims=True)
        mean = s1 * inv_n
        var = s2 * inv_n - mean * mean
        scale = g_ref[...] * jax.lax.rsqrt(var + EPS)
        bias = b_ref[...] - mean * scale
        return acc * scale + bias

    # conv1 -> BN1 -> GELU ; mask restores the zero padding ring (and zero
    # lane/row pads) so conv2 sees correct "same" zero padding.
    y1 = _gelu(conv_bn(xv, w1_ref, g1_ref, b1_ref)) * mask

    # conv2 -> BN2 -> (+ residual) -> GELU   (xv is zero on all invalid lanes)
    z = conv_bn(y1, w2_ref, g2_ref, b2_ref) + xv
    out_ref[...] = _gelu(z)


# --------------------------------- wrapper -----------------------------------
def residual_block_forward(x_nchw, params):
    def pack_w(w):   # (Cout, Cin, 3, 3) -> (9, CP, CP), tap k = ky*3 + kx
        wt = jnp.transpose(w, (2, 3, 0, 1)).reshape(KTAPS, C, C)
        return jnp.pad(wt.astype(jnp.float32),
                       ((0, 0), (0, CP - C), (0, CP - C)))

    def pack_cvec(v):  # (C, 1) -> (CP, 1), zero-padded rows
        return jnp.pad(v.astype(jnp.float32), ((0, CP - C), (0, 0)))

    # NCHW -> channels on sublanes (padded to 8), flattened zero-padded spatial
    # grid on lanes (padded to 768 = 6 exact lane tiles).
    x = jnp.transpose(x_nchw, (1, 0, 2, 3)).astype(jnp.float32)       # (C,B,H,W)
    xp = jnp.pad(x, ((0, CP - C), (0, 0), (1, 1), (1, 1)))            # (CP,B,HP,WP)
    xflat = jnp.pad(xp.reshape(CP, NP), ((0, 0), (0, NPW - NP)))      # (CP,NPW)

    mask = jnp.pad(jnp.ones((1, B, H, W), jnp.float32),
                   ((0, 0), (0, 0), (1, 1), (1, 1))).reshape(1, NP)
    mask = jnp.pad(mask, ((0, 0), (0, NPW - NP)))
    mask = jnp.broadcast_to(mask, (CP, NPW))

    vmem = pl.BlockSpec(memory_space=pltpu.MemorySpace.VMEM)
    out = pl.pallas_call(
        _residual_block_kernel,
        out_shape=jax.ShapeDtypeStruct((CP, NPW), jnp.float32),
        in_specs=[vmem] * 8,
        out_specs=vmem,
    )(xflat, mask,
      pack_w(params['conv1_w']), pack_cvec(params['bn1_gamma']),
      pack_cvec(params['bn1_beta']),
      pack_w(params['conv2_w']), pack_cvec(params['bn2_gamma']),
      pack_cvec(params['bn2_beta']))

    out = out[:C, :NP].reshape(C, B, HP, WP)[:, :, 1:1 + H, 1:1 + W]
    return jnp.transpose(out, (1, 0, 2, 3))                           # NCHW


# ------------------------------ params & reference ---------------------------
def init_params(key):
    k1, k2 = jax.random.split(key)
    scale = 1.0 / jnp.sqrt(9.0 * C)
    return dict(
        conv1_w=jax.random.normal(k1, (C, C, 3, 3), jnp.float32) * scale,
        conv2_w=jax.random.normal(k2, (C, C, 3, 3), jnp.float32) * scale,
        bn1_gamma=jnp.ones((C, 1), jnp.float32),
        bn1_beta=jnp.zeros((C, 1), jnp.float32),
        bn2_gamma=jnp.ones((C, 1), jnp.float32),
        bn2_beta=jnp.zeros((C, 1), jnp.float32),
    )


def residual_block_reference(x, params):
    # Pure-JAX (XLA) reference of the exact same PyTorch forward semantics.
    def conv(h, w):
        return jax.lax.conv_general_dilated(
            h, w, window_strides=(1, 1), padding="SAME",
            dimension_numbers=("NCHW", "OIHW", "NCHW"))

    def bn(h, gamma, beta):
        mean = jnp.mean(h, axis=(0, 2, 3), keepdims=True)
        var = jnp.mean(jnp.square(h - mean), axis=(0, 2, 3), keepdims=True)
        hn = (h - mean) * jax.lax.rsqrt(var + EPS)
        return hn * gamma.reshape(1, C, 1, 1) + beta.reshape(1, C, 1, 1)

    h = jax.nn.gelu(bn(conv(x, params['conv1_w']),
                       params['bn1_gamma'], params['bn1_beta']),
                    approximate=False)
    h = bn(conv(h, params['conv2_w']),
           params['bn2_gamma'], params['bn2_beta']) + x
    return jax.nn.gelu(h, approximate=False)


# ----------------------------------- main -------------------------------------
if __name__ == "__main__":
    root = jax.random.PRNGKey(0)
    k_params, k_x = jax.random.split(root)
    params = init_params(k_params)
    x = jax.random.normal(k_x, (B, C, H, W), jnp.float32)

    fwd = jax.jit(residual_block_forward)
    y = fwd(x, params)
    jax.block_until_ready(y)

    assert y.shape == (B, C, H, W), y.shape
    assert bool(jnp.all(jnp.isfinite(y)))

    y_ref = residual_block_reference(x, params)
    err = float(jnp.max(jnp.abs(y - y_ref)))
    assert err < 1e-3, f"max |pallas - reference| = {err}"

    print("KERNEL_OK")
</pallas_src>

<mosaic_0001>
module attributes {stable_mosaic.version = 11 : i64} {
  func.func @_residual_block_kernel(%arg0: memref<8x768xf32, #tpu.memory_space<vmem>>, %arg1: memref<8x768xf32, #tpu.memory_space<vmem>>, %arg2: memref<9x8x8xf32, #tpu.memory_space<vmem>>, %arg3: memref<8x1xf32, #tpu.memory_space<vmem>>, %arg4: memref<8x1xf32, #tpu.memory_space<vmem>>, %arg5: memref<9x8x8xf32, #tpu.memory_space<vmem>>, %arg6: memref<8x1xf32, #tpu.memory_space<vmem>>, %arg7: memref<8x1xf32, #tpu.memory_space<vmem>>, %arg8: memref<8x768xf32, #tpu.memory_space<vmem>>) attributes {dimension_semantics = [], scalar_prefetch = 0 : i64, scratch_operands = 0 : i64, tpu.core_type = #tpu.core_type<tc>} {
    %c0 = arith.constant 0 : index
    %c0_0 = arith.constant 0 : index
    %0 = vector.load %arg0[%c0, %c0_0] : memref<8x768xf32, #tpu.memory_space<vmem>>, vector<8x768xf32>
    %c0_1 = arith.constant 0 : index
    %c0_2 = arith.constant 0 : index
    %1 = vector.load %arg1[%c0_1, %c0_2] : memref<8x768xf32, #tpu.memory_space<vmem>>, vector<8x768xf32>
    %c4 = arith.constant 4 : index
    %c0_3 = arith.constant 0 : index
    %c0_4 = arith.constant 0 : index
    %2 = vector.load %arg2[%c4, %c0_3, %c0_4] : memref<9x8x8xf32, #tpu.memory_space<vmem>>, vector<1x8x8xf32>
    %3 = vector.shape_cast %2 : vector<1x8x8xf32> to vector<8x8xf32>
    %cst = arith.constant dense<0.000000e+00> : vector<8x768xf32>
    %4 = tpu.matmul %3, %0, %cst {dimension_numbers = #tpu.dot_dimension_numbers<[1], [0], [0], [1], [0, 0, 1, 1], [], []>} : vector<8x8xf32>, vector<8x768xf32>, vector<8x768xf32> -> vector<8x768xf32>
    %c19_i32 = arith.constant 19 : i32
    %5 = tpu.dynamic_rotate %0 by %c19_i32 dim 1 : vector<8x768xf32>, i32 -> vector<8x768xf32>
    %c0_5 = arith.constant 0 : index
    %c0_6 = arith.constant 0 : index
    %c0_7 = arith.constant 0 : index
    %6 = vector.load %arg2[%c0_5, %c0_6, %c0_7] : memref<9x8x8xf32, #tpu.memory_space<vmem>>, vector<1x8x8xf32>
    %7 = vector.shape_cast %6 : vector<1x8x8xf32> to vector<8x8xf32>
    %cst_8 = arith.constant dense<0.000000e+00> : vector<8x768xf32>
    %8 = tpu.matmul %7, %5, %cst_8 {dimension_numbers = #tpu.dot_dimension_numbers<[1], [0], [0], [1], [0, 0, 1, 1], [], []>} : vector<8x8xf32>, vector<8x768xf32>, vector<8x768xf32> -> vector<8x768xf32>
    %9 = arith.addf %4, %8 : vector<8x768xf32>
    %c18_i32 = arith.constant 18 : i32
    %10 = tpu.dynamic_rotate %0 by %c18_i32 dim 1 : vector<8x768xf32>, i32 -> vector<8x768xf32>
    %c1 = arith.constant 1 : index
    %c0_9 = arith.constant 0 : index
    %c0_10 = arith.constant 0 : index
    %11 = vector.load %arg2[%c1, %c0_9, %c0_10] : memref<9x8x8xf32, #tpu.memory_space<vmem>>, vector<1x8x8xf32>
    %12 = vector.shape_cast %11 : vector<1x8x8xf32> to vector<8x8xf32>
    %cst_11 = arith.constant dense<0.000000e+00> : vector<8x768xf32>
    %13 = tpu.matmul %12, %10, %cst_11 {dimension_numbers = #tpu.dot_dimension_numbers<[1], [0], [0], [1], [0, 0, 1, 1], [], []>} : vector<8x8xf32>, vector<8x768xf32>, vector<8x768xf32> -> vector<8x768xf32>
    %14 = arith.addf %9, %13 : vector<8x768xf32>
    %c17_i32 = arith.constant 17 : i32
    %15 = tpu.dynamic_rotate %0 by %c17_i32 dim 1 : vector<8x768xf32>, i32 -> vector<8x768xf32>
    %c2 = arith.constant 2 : index
    %c0_12 = arith.constant 0 : index
    %c0_13 = arith.constant 0 : index
    %16 = vector.load %arg2[%c2, %c0_12, %c0_13] : memref<9x8x8xf32, #tpu.memory_space<vmem>>, vector<1x8x8xf32>
    %17 = vector.shape_cast %16 : vector<1x8x8xf32> to vector<8x8xf32>
    %cst_14 = arith.constant dense<0.000000e+00> : vector<8x768xf32>
    %18 = tpu.matmul %17, %15, %cst_14 {dimension_numbers = #tpu.dot_dimension_numbers<[1], [0], [0], [1], [0, 0, 1, 1], [], []>} : vector<8x8xf32>, vector<8x768xf32>, vector<8x768xf32> -> vector<8x768xf32>
    %19 = arith.addf %14, %18 : vector<8x768xf32>
    %c1_i32 = arith.constant 1 : i32
    %20 = tpu.dynamic_rotate %0 by %c1_i32 dim 1 : vector<8x768xf32>, i32 -> vector<8x768xf32>
    %c3 = arith.constant 3 : index
    %c0_15 = arith.constant 0 : index
    %c0_16 = arith.constant 0 : index
    %21 = vector.load %arg2[%c3, %c0_15, %c0_16] : memref<9x8x8xf32, #tpu.memory_space<vmem>>, vector<1x8x8xf32>
    %22 = vector.shape_cast %21 : vector<1x8x8xf32> to vector<8x8xf32>
    %cst_17 = arith.constant dense<0.000000e+00> : vector<8x768xf32>
    %23 = tpu.matmul %22, %20, %cst_17 {dimension_numbers = #tpu.dot_dimension_numbers<[1], [0], [0], [1], [0, 0, 1, 1], [], []>} : vector<8x8xf32>, vector<8x768xf32>, vector<8x768xf32> -> vector<8x768xf32>
    %24 = arith.addf %19, %23 : vector<8x768xf32>
    %c767_i32 = arith.constant 767 : i32
    %25 = tpu.dynamic_rotate %0 by %c767_i32 dim 1 : vector<8x768xf32>, i32 -> vector<8x768xf32>
    %c5 = arith.constant 5 : index
    %c0_18 = arith.constant 0 : index
    %c0_19 = arith.constant 0 : index
    %26 = vector.load %arg2[%c5, %c0_18, %c0_19] : memref<9x8x8xf32, #tpu.memory_space<vmem>>, vector<1x8x8xf32>
    %27 = vector.shape_cast %26 : vector<1x8x8xf32> to vector<8x8xf32>
    %cst_20 = arith.constant dense<0.000000e+00> : vector<8x768xf32>
    %28 = tpu.matmul %27, %25, %cst_20 {dimension_numbers = #tpu.dot_dimension_numbers<[1], [0], [0], [1], [0, 0, 1, 1], [], []>} : vector<8x8xf32>, vector<8x768xf32>, vector<8x768xf32> -> vector<8x768xf32>
    %29 = arith.addf %24, %28 : vector<8x768xf32>
    %c751_i32 = arith.constant 751 : i32
    %30 = tpu.dynamic_rotate %0 by %c751_i32 dim 1 : vector<8x768xf32>, i32 -> vector<8x768xf32>
    %c6 = arith.constant 6 : index
    %c0_21 = arith.constant 0 : index
    %c0_22 = arith.constant 0 : index
    %31 = vector.load %arg2[%c6, %c0_21, %c0_22] : memref<9x8x8xf32, #tpu.memory_space<vmem>>, vector<1x8x8xf32>
    %32 = vector.shape_cast %31 : vector<1x8x8xf32> to vector<8x8xf32>
    %cst_23 = arith.constant dense<0.000000e+00> : vector<8x768xf32>
    %33 = tpu.matmul %32, %30, %cst_23 {dimension_numbers = #tpu.dot_dimension_numbers<[1], [0], [0], [1], [0, 0, 1, 1], [], []>} : vector<8x8xf32>, vector<8x768xf32>, vector<8x768xf32> -> vector<8x768xf32>
    %34 = arith.addf %29, %33 : vector<8x768xf32>
    %c750_i32 = arith.constant 750 : i32
    %35 = tpu.dynamic_rotate %0 by %c750_i32 dim 1 : vector<8x768xf32>, i32 -> vector<8x768xf32>
    %c7 = arith.constant 7 : index
    %c0_24 = arith.constant 0 : index
    %c0_25 = arith.constant 0 : index
    %36 = vector.load %arg2[%c7, %c0_24, %c0_25] : memref<9x8x8xf32, #tpu.memory_space<vmem>>, vector<1x8x8xf32>
    %37 = vector.shape_cast %36 : vector<1x8x8xf32> to vector<8x8xf32>
    %cst_26 = arith.constant dense<0.000000e+00> : vector<8x768xf32>
    %38 = tpu.matmul %37, %35, %cst_26 {dimension_numbers = #tpu.dot_dimension_numbers<[1], [0], [0], [1], [0, 0, 1, 1], [], []>} : vector<8x8xf32>, vector<8x768xf32>, vector<8x768xf32> -> vector<8x768xf32>
    %39 = arith.addf %34, %38 : vector<8x768xf32>
    %c749_i32 = arith.constant 749 : i32
    %40 = tpu.dynamic_rotate %0 by %c749_i32 dim 1 : vector<8x768xf32>, i32 -> vector<8x768xf32>
    %c8 = arith.constant 8 : index
    %c0_27 = arith.constant 0 : index
    %c0_28 = arith.constant 0 : index
    %41 = vector.load %arg2[%c8, %c0_27, %c0_28] : memref<9x8x8xf32, #tpu.memory_space<vmem>>, vector<1x8x8xf32>
    %42 = vector.shape_cast %41 : vector<1x8x8xf32> to vector<8x8xf32>
    %cst_29 = arith.constant dense<0.000000e+00> : vector<8x768xf32>
    %43 = tpu.matmul %42, %40, %cst_29 {dimension_numbers = #tpu.dot_dimension_numbers<[1], [0], [0], [1], [0, 0, 1, 1], [], []>} : vector<8x8xf32>, vector<8x768xf32>, vector<8x768xf32> -> vector<8x768xf32>
    %44 = arith.addf %39, %43 : vector<8x768xf32>
    %45 = arith.mulf %44, %1 : vector<8x768xf32>
    %cst_30 = arith.constant dense<0.000000e+00> : vector<8xf32>
    %46 = vector.multi_reduction <add>, %45, %cst_30 [1] : vector<8x768xf32> to vector<8xf32>
    %47 = vector.shape_cast %46 : vector<8xf32> to vector<8x1xf32>
    %48 = arith.mulf %45, %44 : vector<8x768xf32>
    %cst_31 = arith.constant dense<0.000000e+00> : vector<8xf32>
    %49 = vector.multi_reduction <add>, %48, %cst_31 [1] : vector<8x768xf32> to vector<8xf32>
    %50 = vector.shape_cast %49 : vector<8xf32> to vector<8x1xf32>
    %cst_32 = arith.constant 0.001953125 : f32
    %51 = vector.broadcast %cst_32 : f32 to vector<8x1xf32>
    %52 = arith.mulf %47, %51 : vector<8x1xf32>
    %cst_33 = arith.constant 0.001953125 : f32
    %53 = vector.broadcast %cst_33 : f32 to vector<8x1xf32>
    %54 = arith.mulf %50, %53 : vector<8x1xf32>
    %55 = arith.mulf %52, %52 : vector<8x1xf32>
    %56 = arith.subf %54, %55 : vector<8x1xf32>
    %c0_34 = arith.constant 0 : index
    %c0_35 = arith.constant 0 : index
    %57 = vector.load %arg3[%c0_34, %c0_35] : memref<8x1xf32, #tpu.memory_space<vmem>>, vector<8x1xf32>
    %cst_36 = arith.constant 9.99999974E-6 : f32
    %58 = vector.broadcast %cst_36 : f32 to vector<8x1xf32>
    %59 = arith.addf %56, %58 : vector<8x1xf32>
    %60 = math.rsqrt %59 : vector<8x1xf32>
    %61 = arith.mulf %57, %60 : vector<8x1xf32>
    %c0_37 = arith.constant 0 : index
    %c0_38 = arith.constant 0 : index
    %62 = vector.load %arg4[%c0_37, %c0_38] : memref<8x1xf32, #tpu.memory_space<vmem>>, vector<8x1xf32>
    %63 = arith.mulf %52, %61 : vector<8x1xf32>
    %64 = arith.subf %62, %63 : vector<8x1xf32>
    %65 = vector.broadcast %61 : vector<8x1xf32> to vector<8x768xf32>
    %66 = arith.mulf %44, %65 : vector<8x768xf32>
    %67 = vector.broadcast %64 : vector<8x1xf32> to vector<8x768xf32>
    %68 = arith.addf %66, %67 : vector<8x768xf32>
    %cst_39 = arith.constant 5.000000e-01 : f32
    %69 = vector.broadcast %cst_39 : f32 to vector<8x768xf32>
    %70 = arith.mulf %69, %68 : vector<8x768xf32>
    %cst_40 = arith.constant 0.707106769 : f32
    %71 = vector.broadcast %cst_40 : f32 to vector<8x768xf32>
    %72 = arith.mulf %68, %71 : vector<8x768xf32>
    %73 = math.absf %72 : vector<8x768xf32>
    %cst_41 = arith.constant 0.327591091 : f32
    %74 = vector.broadcast %cst_41 : f32 to vector<8x768xf32>
    %75 = arith.mulf %74, %73 : vector<8x768xf32>
    %cst_42 = arith.constant 1.000000e+00 : f32
    %76 = vector.broadcast %cst_42 : f32 to vector<8x768xf32>
    %77 = arith.addf %76, %75 : vector<8x768xf32>
    %78 = tpu.reciprocal %77 {approx = true} : vector<8x768xf32> -> vector<8x768xf32>
    %79 = arith.mulf %77, %78 : vector<8x768xf32>
    %cst_43 = arith.constant 2.000000e+00 : f32
    %80 = vector.broadcast %cst_43 : f32 to vector<8x768xf32>
    %81 = arith.subf %80, %79 : vector<8x768xf32>
    %82 = arith.mulf %78, %81 : vector<8x768xf32>
    %cst_44 = arith.constant 1.06140542 : f32
    %83 = vector.broadcast %cst_44 : f32 to vector<8x768xf32>
    %84 = arith.mulf %82, %83 : vector<8x768xf32>
    %cst_45 = arith.constant -1.45315206 : f32
    %85 = vector.broadcast %cst_45 : f32 to vector<8x768xf32>
    %86 = arith.addf %85, %84 : vector<8x768xf32>
    %87 = arith.mulf %82, %86 : vector<8x768xf32>
    %cst_46 = arith.constant 1.42141378 : f32
    %88 = vector.broadcast %cst_46 : f32 to vector<8x768xf32>
    %89 = arith.addf %88, %87 : vector<8x768xf32>
    %90 = arith.mulf %82, %89 : vector<8x768xf32>
    %cst_47 = arith.constant -0.284496725 : f32
    %91 = vector.broadcast %cst_47 : f32 to vector<8x768xf32>
    %92 = arith.addf %91, %90 : vector<8x768xf32>
    %93 = arith.mulf %82, %92 : vector<8x768xf32>
    %cst_48 = arith.constant 0.254829586 : f32
    %94 = vector.broadcast %cst_48 : f32 to vector<8x768xf32>
    %95 = arith.addf %94, %93 : vector<8x768xf32>
    %96 = arith.mulf %82, %95 : vector<8x768xf32>
    %cst_49 = arith.constant 0.000000e+00 : f32
    %97 = vector.broadcast %cst_49 : f32 to vector<8x768xf32>
    %98 = arith.subf %97, %73 : vector<8x768xf32>
    %99 = arith.mulf %98, %73 : vector<8x768xf32>
    %100 = math.exp %99 : vector<8x768xf32>
    %101 = arith.mulf %96, %100 : vector<8x768xf32>
    %cst_50 = arith.constant 1.000000e+00 : f32
    %102 = vector.broadcast %cst_50 : f32 to vector<8x768xf32>
    %103 = arith.subf %102, %101 : vector<8x768xf32>
    %cst_51 = arith.constant 0.000000e+00 : f32
    %104 = vector.broadcast %cst_51 : f32 to vector<8x768xf32>
    %105 = arith.cmpf oge, %72, %104 : vector<8x768xf32>
    %cst_52 = arith.constant 0.000000e+00 : f32
    %106 = vector.broadcast %cst_52 : f32 to vector<8x768xf32>
    %107 = arith.subf %106, %103 : vector<8x768xf32>
    %108 = arith.select %105, %103, %107 : vector<8x768xi1>, vector<8x768xf32>
    %cst_53 = arith.constant 1.000000e+00 : f32
    %109 = vector.broadcast %cst_53 : f32 to vector<8x768xf32>
    %110 = arith.addf %109, %108 : vector<8x768xf32>
    %111 = arith.mulf %70, %110 : vector<8x768xf32>
    %112 = arith.mulf %111, %1 : vector<8x768xf32>
    %c4_54 = arith.constant 4 : index
    %c0_55 = arith.constant 0 : index
    %c0_56 = arith.constant 0 : index
    %113 = vector.load %arg5[%c4_54, %c0_55, %c0_56] : memref<9x8x8xf32, #tpu.memory_space<vmem>>, vector<1x8x8xf32>
    %114 = vector.shape_cast %113 : vector<1x8x8xf32> to vector<8x8xf32>
    %cst_57 = arith.constant dense<0.000000e+00> : vector<8x768xf32>
    %115 = tpu.matmul %114, %112, %cst_57 {dimension_numbers = #tpu.dot_dimension_numbers<[1], [0], [0], [1], [0, 0, 1, 1], [], []>} : vector<8x8xf32>, vector<8x768xf32>, vector<8x768xf32> -> vector<8x768xf32>
    %c19_i32_58 = arith.constant 19 : i32
    %116 = tpu.dynamic_rotate %112 by %c19_i32_58 dim 1 : vector<8x768xf32>, i32 -> vector<8x768xf32>
    %c0_59 = arith.constant 0 : index
    %c0_60 = arith.constant 0 : index
    %c0_61 = arith.constant 0 : index
    %117 = vector.load %arg5[%c0_59, %c0_60, %c0_61] : memref<9x8x8xf32, #tpu.memory_space<vmem>>, vector<1x8x8xf32>
    %118 = vector.shape_cast %117 : vector<1x8x8xf32> to vector<8x8xf32>
    %cst_62 = arith.constant dense<0.000000e+00> : vector<8x768xf32>
    %119 = tpu.matmul %118, %116, %cst_62 {dimension_numbers = #tpu.dot_dimension_numbers<[1], [0], [0], [1], [0, 0, 1, 1], [], []>} : vector<8x8xf32>, vector<8x768xf32>, vector<8x768xf32> -> vector<8x768xf32>
    %120 = arith.addf %115, %119 : vector<8x768xf32>
    %c18_i32_63 = arith.constant 18 : i32
    %121 = tpu.dynamic_rotate %112 by %c18_i32_63 dim 1 : vector<8x768xf32>, i32 -> vector<8x768xf32>
    %c1_64 = arith.constant 1 : index
    %c0_65 = arith.constant 0 : index
    %c0_66 = arith.constant 0 : index
    %122 = vector.load %arg5[%c1_64, %c0_65, %c0_66] : memref<9x8x8xf32, #tpu.memory_space<vmem>>, vector<1x8x8xf32>
    %123 = vector.shape_cast %122 : vector<1x8x8xf32> to vector<8x8xf32>
    %cst_67 = arith.constant dense<0.000000e+00> : vector<8x768xf32>
    %124 = tpu.matmul %123, %121, %cst_67 {dimension_numbers = #tpu.dot_dimension_numbers<[1], [0], [0], [1], [0, 0, 1, 1], [], []>} : vector<8x8xf32>, vector<8x768xf32>, vector<8x768xf32> -> vector<8x768xf32>
    %125 = arith.addf %120, %124 : vector<8x768xf32>
    %c17_i32_68 = arith.constant 17 : i32
    %126 = tpu.dynamic_rotate %112 by %c17_i32_68 dim 1 : vector<8x768xf32>, i32 -> vector<8x768xf32>
    %c2_69 = arith.constant 2 : index
    %c0_70 = arith.constant 0 : index
    %c0_71 = arith.constant 0 : index
    %127 = vector.load %arg5[%c2_69, %c0_70, %c0_71] : memref<9x8x8xf32, #tpu.memory_space<vmem>>, vector<1x8x8xf32>
    %128 = vector.shape_cast %127 : vector<1x8x8xf32> to vector<8x8xf32>
    %cst_72 = arith.constant dense<0.000000e+00> : vector<8x768xf32>
    %129 = tpu.matmul %128, %126, %cst_72 {dimension_numbers = #tpu.dot_dimension_numbers<[1], [0], [0], [1], [0, 0, 1, 1], [], []>} : vector<8x8xf32>, vector<8x768xf32>, vector<8x768xf32> -> vector<8x768xf32>
    %130 = arith.addf %125, %129 : vector<8x768xf32>
    %c1_i32_73 = arith.constant 1 : i32
    %131 = tpu.dynamic_rotate %112 by %c1_i32_73 dim 1 : vector<8x768xf32>, i32 -> vector<8x768xf32>
    %c3_74 = arith.constant 3 : index
    %c0_75 = arith.constant 0 : index
    %c0_76 = arith.constant 0 : index
    %132 = vector.load %arg5[%c3_74, %c0_75, %c0_76] : memref<9x8x8xf32, #tpu.memory_space<vmem>>, vector<1x8x8xf32>
    %133 = vector.shape_cast %132 : vector<1x8x8xf32> to vector<8x8xf32>
    %cst_77 = arith.constant dense<0.000000e+00> : vector<8x768xf32>
    %134 = tpu.matmul %133, %131, %cst_77 {dimension_numbers = #tpu.dot_dimension_numbers<[1], [0], [0], [1], [0, 0, 1, 1], [], []>} : vector<8x8xf32>, vector<8x768xf32>, vector<8x768xf32> -> vector<8x768xf32>
    %135 = arith.addf %130, %134 : vector<8x768xf32>
    %c767_i32_78 = arith.constant 767 : i32
    %136 = tpu.dynamic_rotate %112 by %c767_i32_78 dim 1 : vector<8x768xf32>, i32 -> vector<8x768xf32>
    %c5_79 = arith.constant 5 : index
    %c0_80 = arith.constant 0 : index
    %c0_81 = arith.constant 0 : index
    %137 = vector.load %arg5[%c5_79, %c0_80, %c0_81] : memref<9x8x8xf32, #tpu.memory_space<vmem>>, vector<1x8x8xf32>
    %138 = vector.shape_cast %137 : vector<1x8x8xf32> to vector<8x8xf32>
    %cst_82 = arith.constant dense<0.000000e+00> : vector<8x768xf32>
    %139 = tpu.matmul %138, %136, %cst_82 {dimension_numbers = #tpu.dot_dimension_numbers<[1], [0], [0], [1], [0, 0, 1, 1], [], []>} : vector<8x8xf32>, vector<8x768xf32>, vector<8x768xf32> -> vector<8x768xf32>
    %140 = arith.addf %135, %139 : vector<8x768xf32>
    %c751_i32_83 = arith.constant 751 : i32
    %141 = tpu.dynamic_rotate %112 by %c751_i32_83 dim 1 : vector<8x768xf32>, i32 -> vector<8x768xf32>
    %c6_84 = arith.constant 6 : index
    %c0_85 = arith.constant 0 : index
    %c0_86 = arith.constant 0 : index
    %142 = vector.load %arg5[%c6_84, %c0_85, %c0_86] : memref<9x8x8xf32, #tpu.memory_space<vmem>>, vector<1x8x8xf32>
    %143 = vector.shape_cast %142 : vector<1x8x8xf32> to vector<8x8xf32>
    %cst_87 = arith.constant dense<0.000000e+00> : vector<8x768xf32>
    %144 = tpu.matmul %143, %141, %cst_87 {dimension_numbers = #tpu.dot_dimension_numbers<[1], [0], [0], [1], [0, 0, 1, 1], [], []>} : vector<8x8xf32>, vector<8x768xf32>, vector<8x768xf32> -> vector<8x768xf32>
    %145 = arith.addf %140, %144 : vector<8x768xf32>
    %c750_i32_88 = arith.constant 750 : i32
    %146 = tpu.dynamic_rotate %112 by %c750_i32_88 dim 1 : vector<8x768xf32>, i32 -> vector<8x768xf32>
    %c7_89 = arith.constant 7 : index
    %c0_90 = arith.constant 0 : index
    %c0_91 = arith.constant 0 : index
    %147 = vector.load %arg5[%c7_89, %c0_90, %c0_91] : memref<9x8x8xf32, #tpu.memory_space<vmem>>, vector<1x8x8xf32>
    %148 = vector.shape_cast %147 : vector<1x8x8xf32> to vector<8x8xf32>
    %cst_92 = arith.constant dense<0.000000e+00> : vector<8x768xf32>
    %149 = tpu.matmul %148, %146, %cst_92 {dimension_numbers = #tpu.dot_dimension_numbers<[1], [0], [0], [1], [0, 0, 1, 1], [], []>} : vector<8x8xf32>, vector<8x768xf32>, vector<8x768xf32> -> vector<8x768xf32>
    %150 = arith.addf %145, %149 : vector<8x768xf32>
    %c749_i32_93 = arith.constant 749 : i32
    %151 = tpu.dynamic_rotate %112 by %c749_i32_93 dim 1 : vector<8x768xf32>, i32 -> vector<8x768xf32>
    %c8_94 = arith.constant 8 : index
    %c0_95 = arith.constant 0 : index
    %c0_96 = arith.constant 0 : index
    %152 = vector.load %arg5[%c8_94, %c0_95, %c0_96] : memref<9x8x8xf32, #tpu.memory_space<vmem>>, vector<1x8x8xf32>
    %153 = vector.shape_cast %152 : vector<1x8x8xf32> to vector<8x8xf32>
    %cst_97 = arith.constant dense<0.000000e+00> : vector<8x768xf32>
    %154 = tpu.matmul %153, %151, %cst_97 {dimension_numbers = #tpu.dot_dimension_numbers<[1], [0], [0], [1], [0, 0, 1, 1], [], []>} : vector<8x8xf32>, vector<8x768xf32>, vector<8x768xf32> -> vector<8x768xf32>
    %155 = arith.addf %150, %154 : vector<8x768xf32>
    %156 = arith.mulf %155, %1 : vector<8x768xf32>
    %cst_98 = arith.constant dense<0.000000e+00> : vector<8xf32>
    %157 = vector.multi_reduction <add>, %156, %cst_98 [1] : vector<8x768xf32> to vector<8xf32>
    %158 = vector.shape_cast %157 : vector<8xf32> to vector<8x1xf32>
    %159 = arith.mulf %156, %155 : vector<8x768xf32>
    %cst_99 = arith.constant dense<0.000000e+00> : vector<8xf32>
    %160 = vector.multi_reduction <add>, %159, %cst_99 [1] : vector<8x768xf32> to vector<8xf32>
    %161 = vector.shape_cast %160 : vector<8xf32> to vector<8x1xf32>
    %cst_100 = arith.constant 0.001953125 : f32
    %162 = vector.broadcast %cst_100 : f32 to vector<8x1xf32>
    %163 = arith.mulf %158, %162 : vector<8x1xf32>
    %cst_101 = arith.constant 0.001953125 : f32
    %164 = vector.broadcast %cst_101 : f32 to vector<8x1xf32>
    %165 = arith.mulf %161, %164 : vector<8x1xf32>
    %166 = arith.mulf %163, %163 : vector<8x1xf32>
    %167 = arith.subf %165, %166 : vector<8x1xf32>
    %c0_102 = arith.constant 0 : index
    %c0_103 = arith.constant 0 : index
    %168 = vector.load %arg6[%c0_102, %c0_103] : memref<8x1xf32, #tpu.memory_space<vmem>>, vector<8x1xf32>
    %cst_104 = arith.constant 9.99999974E-6 : f32
    %169 = vector.broadcast %cst_104 : f32 to vector<8x1xf32>
    %170 = arith.addf %167, %169 : vector<8x1xf32>
    %171 = math.rsqrt %170 : vector<8x1xf32>
    %172 = arith.mulf %168, %171 : vector<8x1xf32>
    %c0_105 = arith.constant 0 : index
    %c0_106 = arith.constant 0 : index
    %173 = vector.load %arg7[%c0_105, %c0_106] : memref<8x1xf32, #tpu.memory_space<vmem>>, vector<8x1xf32>
    %174 = arith.mulf %163, %172 : vector<8x1xf32>
    %175 = arith.subf %173, %174 : vector<8x1xf32>
    %176 = vector.broadcast %172 : vector<8x1xf32> to vector<8x768xf32>
    %177 = arith.mulf %155, %176 : vector<8x768xf32>
    %178 = vector.broadcast %175 : vector<8x1xf32> to vector<8x768xf32>
    %179 = arith.addf %177, %178 : vector<8x768xf32>
    %180 = arith.addf %179, %0 : vector<8x768xf32>
    %cst_107 = arith.constant 5.000000e-01 : f32
    %181 = vector.broadcast %cst_107 : f32 to vector<8x768xf32>
    %182 = arith.mulf %181, %180 : vector<8x768xf32>
    %cst_108 = arith.constant 0.707106769 : f32
    %183 = vector.broadcast %cst_108 : f32 to vector<8x768xf32>
    %184 = arith.mulf %180, %183 : vector<8x768xf32>
    %185 = math.absf %184 : vector<8x768xf32>
    %cst_109 = arith.constant 0.327591091 : f32
    %186 = vector.broadcast %cst_109 : f32 to vector<8x768xf32>
    %187 = arith.mulf %186, %185 : vector<8x768xf32>
    %cst_110 = arith.constant 1.000000e+00 : f32
    %188 = vector.broadcast %cst_110 : f32 to vector<8x768xf32>
    %189 = arith.addf %188, %187 : vector<8x768xf32>
    %190 = tpu.reciprocal %189 {approx = true} : vector<8x768xf32> -> vector<8x768xf32>
    %191 = arith.mulf %189, %190 : vector<8x768xf32>
    %cst_111 = arith.constant 2.000000e+00 : f32
    %192 = vector.broadcast %cst_111 : f32 to vector<8x768xf32>
    %193 = arith.subf %192, %191 : vector<8x768xf32>
    %194 = arith.mulf %190, %193 : vector<8x768xf32>
    %cst_112 = arith.constant 1.06140542 : f32
    %195 = vector.broadcast %cst_112 : f32 to vector<8x768xf32>
    %196 = arith.mulf %194, %195 : vector<8x768xf32>
    %cst_113 = arith.constant -1.45315206 : f32
    %197 = vector.broadcast %cst_113 : f32 to vector<8x768xf32>
    %198 = arith.addf %197, %196 : vector<8x768xf32>
    %199 = arith.mulf %194, %198 : vector<8x768xf32>
    %cst_114 = arith.constant 1.42141378 : f32
    %200 = vector.broadcast %cst_114 : f32 to vector<8x768xf32>
    %201 = arith.addf %200, %199 : vector<8x768xf32>
    %202 = arith.mulf %194, %201 : vector<8x768xf32>
    %cst_115 = arith.constant -0.284496725 : f32
    %203 = vector.broadcast %cst_115 : f32 to vector<8x768xf32>
    %204 = arith.addf %203, %202 : vector<8x768xf32>
    %205 = arith.mulf %194, %204 : vector<8x768xf32>
    %cst_116 = arith.constant 0.254829586 : f32
    %206 = vector.broadcast %cst_116 : f32 to vector<8x768xf32>
    %207 = arith.addf %206, %205 : vector<8x768xf32>
    %208 = arith.mulf %194, %207 : vector<8x768xf32>
    %cst_117 = arith.constant 0.000000e+00 : f32
    %209 = vector.broadcast %cst_117 : f32 to vector<8x768xf32>
    %210 = arith.subf %209, %185 : vector<8x768xf32>
    %211 = arith.mulf %210, %185 : vector<8x768xf32>
    %212 = math.exp %211 : vector<8x768xf32>
    %213 = arith.mulf %208, %212 : vector<8x768xf32>
    %cst_118 = arith.constant 1.000000e+00 : f32
    %214 = vector.broadcast %cst_118 : f32 to vector<8x768xf32>
    %215 = arith.subf %214, %213 : vector<8x768xf32>
    %cst_119 = arith.constant 0.000000e+00 : f32
    %216 = vector.broadcast %cst_119 : f32 to vector<8x768xf32>
    %217 = arith.cmpf oge, %184, %216 : vector<8x768xf32>
    %cst_120 = arith.constant 0.000000e+00 : f32
    %218 = vector.broadcast %cst_120 : f32 to vector<8x768xf32>
    %219 = arith.subf %218, %215 : vector<8x768xf32>
    %220 = arith.select %217, %215, %219 : vector<8x768xi1>, vector<8x768xf32>
    %cst_121 = arith.constant 1.000000e+00 : f32
    %221 = vector.broadcast %cst_121 : f32 to vector<8x768xf32>
    %222 = arith.addf %221, %220 : vector<8x768xf32>
    %223 = arith.mulf %182, %222 : vector<8x768xf32>
    %c0_122 = arith.constant 0 : index
    %c0_123 = arith.constant 0 : index
    %224 = vector.load %arg8[%c0_122, %c0_123] : memref<8x768xf32, #tpu.memory_space<vmem>>, vector<8x768xf32>
    tpu.vector_store %arg8[%c0_122, %c0_123], %223 {strides = array<i32>} : memref<8x768xf32, #tpu.memory_space<vmem>>, vector<8x768xf32>,
    return
  }
}

</mosaic_0001>

<bundles_post_ra>
// kernel: residual_block_forward.1
= control target key start
LH: loop header
LB: loop body
LE: loop exit
PB: predicated region body
PF: predicated region fallthrough
CT: control target
= control target key end

     0   :  { %v5076_v2 = vmov 0.0   ;;  %s5077_s9 = smov 19   ;;  %s5078_s18 = smov 18   ;;  %v55_v7 = vlaneseq  ;;  %vm65_vm1 = vcmask 64512   ;;  %s6049_s0 = inlined_call_operand.vmem [shape: f32[8,768], index: 0, kind: input, shape index: {}]   ;;  %s6050_s2 = inlined_call_operand.vmem [shape: f32[9,8,8], index: 2, kind: input, shape index: {}]   ;;  %s6051_s1 = inlined_call_operand.vmem [shape: f32[8,768], index: 1, kind: input, shape index: {}]   ;;  %s6052_s3 = inlined_call_operand.vmem [shape: f32[8,1], index: 3, kind: input, shape index: {}]   ;;  %s6053_s4 = inlined_call_operand.vmem [shape: f32[8,1], index: 4, kind: input, shape index: {}]   ;;  %s6054_s5 = inlined_call_operand.vmem [shape: f32[9,8,8], index: 5, kind: input, shape index: {}]   ;;  %s6055_s6 = inlined_call_operand.vmem [shape: f32[8,1], index: 6, kind: input, shape index: {}]   ;;  %s6056_s7 = inlined_call_operand.vmem [shape: f32[8,1], index: 7, kind: input, shape index: {}]   ;;  %s6057_s8 = inlined_call_operand.vmem [shape: f32[8,768], index: 8, kind: output, shape index: {}]  }
   0x1   :  { %v5134_v0 = vld [vmem:[%s6049_s0 + $0x28] sm:$0xff]  ;;  %v5139_v1 = vld [vmem:[%s6049_s0] sm:$0xff]  ;;  %133 = vmatprep.mubr.f32.mxu0 %v5076_v2  ;;  %2526 = vmatprep.mubr.f32.mxu1 %v5076_v2  ;;  %v5150_v3 = vld [vmem:[%s6049_s0 + $0x10] sm:$0xff]  ;;  %s5079_s19 = smov 17   ;;  %s5080_s20 = smov 1  }
   0x2   :  { %53 = vrot.lane.b32.xlu1 %v5134_v0, %s5077_s9  ;;  %43 = vrot.lane.b32.xlu0 %v5139_v1, %s5077_s9  ;;  %v5155_v4 = vld [vmem:[%s6049_s0 + $0x8] sm:$0xff]  ;;  %v5164_v5 = vld [vmem:[%s6049_s0 + $0x20] sm:$0xff]  ;;  %s5081_s21 = smov 127   ;;  %s5082_s22 = smov 111   ;;  %v5259_v8 = vand.u32 127, %v55_v7 }
   0x3   :  { %v5169_v6 = vld [vmem:[%s6049_s0 + $0x18] sm:$0xff]  ;;  %s5083_s23 = smov 110   ;;  %s5084_s24 = smov 109   ;;  %v64_v14 = vld [vmem:[%s6050_s2] sm:$0xff]  ;;  %v4841_v36 = vld [vmem:[%s6050_s2 + $0x8] sm:$0xff] }
   0x4   :  { %vm57_vm0 = vcmp.lt.s32.totalorder %v5259_v8, 19  ;;  %v4834_v26 = vld [vmem:[%s6050_s2 + $0x20] sm:$0xff]  ;;  %vm510_vm2 = vcmp.lt.s32.totalorder %v5259_v8, 18  ;;  %vm753_vm3 = vcmp.lt.s32.totalorder %v5259_v8, 17  ;;  %v4845_v49 = vld [vmem:[%s6050_s2 + $0x10] sm:$0xff]  ;;  %vm996_vm4 = vcmp.lt.s32.totalorder %v5259_v8, 1 }
   0x5   :  { %v4849_v62 = vld [vmem:[%s6050_s2 + $0x18] sm:$0xff]  ;;  %vm1239_vm5 = vcmp.lt.s32.totalorder %v5259_v8, 127  ;;  %vm1482_vm6 = vcmp.lt.s32.totalorder %v5259_v8, 111  ;;  %vm1725_vm7 = vcmp.lt.s32.totalorder %v5259_v8, 110  ;;  %vm1968_vm8 = vcmp.lt.s32.totalorder %v5259_v8, 109 }
   0x6   :  { %47 = vrot.lane.b32.xlu1 %v5150_v3, %s5077_s9  ;;  %45 = vrot.lane.b32.xlu0 %v5155_v4, %s5077_s9 }
   0xa   :  { %51 = vrot.lane.b32.xlu1 %v5164_v5, %s5077_s9  ;;  %49 = vrot.lane.b32.xlu0 %v5169_v6, %s5077_s9 }
   0xe   :  { %500 = vrot.lane.b32.xlu1 %v5155_v4, %s5078_s18  ;;  %498 = vrot.lane.b32.xlu0 %v5139_v1, %s5078_s18 }
  0x12   :  { %502 = vrot.lane.b32.xlu1 %v5150_v3, %s5078_s18  ;;  %508 = vrot.lane.b32.xlu0 %v5134_v0, %s5078_s18 }
  0x16   :  { %506 = vrot.lane.b32.xlu1 %v5164_v5, %s5078_s18  ;;  %504 = vrot.lane.b32.xlu0 %v5169_v6, %s5078_s18 }
  0x1a   :  { %743 = vrot.lane.b32.xlu1 %v5155_v4, %s5079_s19  ;;  %741 = vrot.lane.b32.xlu0 %v5139_v1, %s5079_s19 }
  0x1e   :  { %745 = vrot.lane.b32.xlu1 %v5150_v3, %s5079_s19  ;;  %751 = vrot.lane.b32.xlu0 %v5134_v0, %s5079_s19 }
  0x22   :  { %749 = vrot.lane.b32.xlu1 %v5164_v5, %s5079_s19  ;;  %747 = vrot.lane.b32.xlu0 %v5169_v6, %s5079_s19 }
  0x26   :  { %986 = vrot.lane.b32.xlu1 %v5155_v4, %s5080_s20  ;;  %984 = vrot.lane.b32.xlu0 %v5139_v1, %s5080_s20 }
  0x2a   :  { %988 = vrot.lane.b32.xlu1 %v5150_v3, %s5080_s20  ;;  %994 = vrot.lane.b32.xlu0 %v5134_v0, %s5080_s20 }
  0x2e   :  { %992 = vrot.lane.b32.xlu1 %v5164_v5, %s5080_s20  ;;  %990 = vrot.lane.b32.xlu0 %v5169_v6, %s5080_s20 }
  0x32   :  { %1231 = vrot.lane.b32.xlu1 %v5150_v3, %s5081_s21  ;;  %1229 = vrot.lane.b32.xlu0 %v5155_v4, %s5081_s21 }
  0x36   :  { %1233 = vrot.lane.b32.xlu1 %v5169_v6, %s5081_s21  ;;  %1227 = vrot.lane.b32.xlu0 %v5139_v1, %s5081_s21 }
  0x3a   :  { %1237 = vrot.lane.b32.xlu1 %v5134_v0, %s5081_s21  ;;  %1235 = vrot.lane.b32.xlu0 %v5164_v5, %s5081_s21 }
  0x3e   :  { %1474 = vrot.lane.b32.xlu1 %v5150_v3, %s5082_s22  ;;  %1472 = vrot.lane.b32.xlu0 %v5155_v4, %s5082_s22 }
  0x42   :  { %1476 = vrot.lane.b32.xlu1 %v5169_v6, %s5082_s22  ;;  %1470 = vrot.lane.b32.xlu0 %v5139_v1, %s5082_s22 }
  0x46   :  { %1480 = vrot.lane.b32.xlu1 %v5134_v0, %s5082_s22  ;;  %1478 = vrot.lane.b32.xlu0 %v5164_v5, %s5082_s22 }
  0x4a   :  { %1717 = vrot.lane.b32.xlu1 %v5150_v3, %s5083_s23  ;;  %1715 = vrot.lane.b32.xlu0 %v5155_v4, %s5083_s23 }
  0x4e   :  { %1719 = vrot.lane.b32.xlu1 %v5169_v6, %s5083_s23  ;;  %1713 = vrot.lane.b32.xlu0 %v5139_v1, %s5083_s23 }
  0x52   :  { %1723 = vrot.lane.b32.xlu1 %v5134_v0, %s5083_s23  ;;  %1721 = vrot.lane.b32.xlu0 %v5164_v5, %s5083_s23 }
  0x56   :  { %1960 = vrot.lane.b32.xlu1 %v5150_v3, %s5084_s24  ;;  %1958 = vrot.lane.b32.xlu0 %v5155_v4, %s5084_s24 }
  0x5a   :  { %1962 = vrot.lane.b32.xlu1 %v5169_v6, %s5084_s24  ;;  %1956 = vrot.lane.b32.xlu0 %v5139_v1, %s5084_s24 }
  0x5e   :  { %1966 = vrot.lane.b32.xlu1 %v5134_v0, %s5084_s24  ;;  %1964 = vrot.lane.b32.xlu0 %v5164_v5, %s5084_s24 }
  0x74   :  { %v54_v9 = vpop.permute.xlu1 %53  ;;  %v44_v10 = vpop.permute.xlu0 %43 }
  0x75   :  { %v63_v15 = vsel %vm57_vm0, %v54_v9, %v44_v10 }
  0x78   :  { %v48_v11 = vpop.permute.xlu1 %47  ;;  %v46_v12 = vpop.permute.xlu0 %45 }
  0x79   :  { %v62_v13 = vsel %vm57_vm0, %v44_v10, %v46_v12  ;;  %v61_v19 = vsel %vm57_vm0, %v46_v12, %v48_v11 }
  0x7a   :  { %69 = vmatprep.subr.mxu0 %v62_v13  ;;  %v4853_v13 = vld [vmem:[%s6050_s2 + $0x28] sm:$0xff] }
  0x7b   :  { %70 = vmatpush1.msra.mxu0 %v63_v15 }
  0x7c   :  { %v52_v16 = vpop.permute.xlu1 %51  ;;  %4835 = vmatmul.mubr.msk.f32.vlgmr.msra.gmra.mrb[0].mxu0 %vm65_vm1, %v64_v14  ;;  %v50_v17 = vpop.permute.xlu0 %49 }
  0x7d   :  { %v60_v18 = vsel %vm57_vm0, %v48_v11, %v50_v17  ;;  %204 = vmatprep.mubr.f32.mxu0 %v5076_v2  ;;  %v58_v20 = vsel %vm57_vm0, %v52_v16, %v54_v9  ;;  %v59_v21 = vsel %vm57_vm0, %v50_v17, %v52_v16 }
  0x7e   :  { %140 = vmatprep.subr.mxu0 %v60_v18 }
  0x7f   :  { %141 = vmatpush1.msra.mxu0 %v61_v19 }
  0x80   :  { %4836 = vmatmul.mubr.msk.f32.vlgmr.msra.gmra.mrb[2].mxu0 %vm65_vm1, %v64_v14  ;;  %211 = vmatprep.subr.mxu0 %v58_v20  ;;  %v501_v22 = vpop.permute.xlu1 %500  ;;  %v499_v23 = vpop.permute.xlu0 %498 }
  0x81   :  { %212 = vmatpush1.msra.mxu0 %v59_v21  ;;  %275 = vmatprep.mubr.f32.mxu0 %v5076_v2  ;;  %v515_v29 = vsel %vm510_vm2, %v499_v23, %v501_v22 }
  0x82   :  { %285 = vmatprep.subr.mxu0 %v5155_v4 }
  0x84   :  { %4837 = vmatmul.mubr.msk.f32.vlgmr.msra.gmra.mrb[4].mxu0 %vm65_vm1, %v64_v14  ;;  %v503_v24 = vpop.permute.xlu1 %502  ;;  %v509_v25 = vpop.permute.xlu0 %508 }
  0x85   :  { %286 = vmatpush1.msra.mxu0 %v5139_v1  ;;  %349 = vmatprep.mubr.f32.mxu0 %v5076_v2  ;;  %v516_v33 = vsel %vm510_vm2, %v509_v25, %v499_v23  ;;  %v514_v37 = vsel %vm510_vm2, %v501_v22, %v503_v24 }
  0x86   :  { %356 = vmatprep.subr.mxu0 %v5169_v6 }
  0x88   :  { %4838 = vmatmul.mubr.msk.f32.vlgmr.msra.gmra.mrb[0].mxu0 %vm65_vm1, %v4834_v26  ;;  %v507_v27 = vpop.permute.xlu1 %506  ;;  %v505_v28 = vpop.permute.xlu0 %504 }
  0x89   :  { %357 = vmatpush1.msra.mxu0 %v5150_v3  ;;  %420 = vmatprep.mubr.f32.mxu0 %v5076_v2  ;;  %v513_v32 = vsel %vm510_vm2, %v503_v24, %v505_v28  ;;  %v511_v40 = vsel %vm510_vm2, %v507_v27, %v509_v25  ;;  %v512_v42 = vsel %vm510_vm2, %v505_v28, %v507_v27  ;;  %v4857_v25 = vld [vmem:[%s6050_s2 + $0x30] sm:$0xff] }
  0x8a   :  { %427 = vmatprep.subr.mxu0 %v5134_v0 }
  0x8c   :  { %4839 = vmatmul.mubr.msk.f32.vlgmr.msra.gmra.mrb[2].mxu0 %vm65_vm1, %v4834_v26  ;;  %v744_v30 = vpop.permute.xlu1 %743  ;;  %v742_v31 = vpop.permute.xlu0 %741 }
  0x8d   :  { %428 = vmatpush1.msra.mxu0 %v5164_v5  ;;  %491 = vmatprep.mubr.f32.mxu0 %v5076_v2  ;;  %v758_v41 = vsel %vm753_vm3, %v742_v31, %v744_v30 }
  0x8e   :  { %522 = vmatprep.subr.mxu0 %v515_v29 }
  0x90   :  { %4840 = vmatmul.mubr.msk.f32.vlgmr.msra.gmra.mrb[4].mxu0 %vm65_vm1, %v4834_v26  ;;  %v746_v34 = vpop.permute.xlu1 %745  ;;  %v752_v35 = vpop.permute.xlu0 %751 }
  0x91   :  { %523 = vmatpush1.msra.mxu0 %v516_v33  ;;  %586 = vmatprep.mubr.f32.mxu0 %v5076_v2  ;;  %v759_v46 = vsel %vm753_vm3, %v752_v35, %v742_v31  ;;  %v757_v50 = vsel %vm753_vm3, %v744_v30, %v746_v34 }
  0x92   :  { %593 = vmatprep.subr.mxu0 %v513_v32 }
  0x94   :  { %4842 = vmatmul.mubr.msk.f32.vlgmr.msra.gmra.mrb[0].mxu0 %vm65_vm1, %v4841_v36  ;;  %v750_v38 = vpop.permute.xlu1 %749  ;;  %v748_v39 = vpop.permute.xlu0 %747 }
  0x95   :  { %594 = vmatpush1.msra.mxu0 %v514_v37  ;;  %657 = vmatprep.mubr.f32.mxu0 %v5076_v2  ;;  %v756_v45 = vsel %vm753_vm3, %v746_v34, %v748_v39  ;;  %v754_v53 = vsel %vm753_vm3, %v750_v38, %v752_v35  ;;  %v755_v55 = vsel %vm753_vm3, %v748_v39, %v750_v38 }
  0x96   :  { %664 = vmatprep.subr.mxu0 %v511_v40 }
  0x98   :  { %4843 = vmatmul.mubr.msk.f32.vlgmr.msra.gmra.mrb[2].mxu0 %vm65_vm1, %v4841_v36  ;;  %v987_v43 = vpop.permute.xlu1 %986  ;;  %v985_v44 = vpop.permute.xlu0 %984 }
  0x99   :  { %665 = vmatpush1.msra.mxu0 %v512_v42  ;;  %728 = vmatprep.mubr.f32.mxu0 %v5076_v2  ;;  %v1001_v54 = vsel %vm996_vm4, %v985_v44, %v987_v43 }
  0x9a   :  { %765 = vmatprep.subr.mxu0 %v758_v41 }
  0x9c   :  { %4844 = vmatmul.mubr.msk.f32.vlgmr.msra.gmra.mrb[4].mxu0 %vm65_vm1, %v4841_v36  ;;  %v989_v47 = vpop.permute.xlu1 %988  ;;  %v995_v48 = vpop.permute.xlu0 %994  ;;  %v4861_v36 = vld [vmem:[%s6050_s2 + $0x38] sm:$0xff] }
  0x9d   :  { %766 = vmatpush1.msra.mxu0 %v759_v46  ;;  %829 = vmatprep.mubr.f32.mxu0 %v5076_v2  ;;  %v1002_v59 = vsel %vm996_vm4, %v995_v48, %v985_v44  ;;  %v1000_v63 = vsel %vm996_vm4, %v987_v43, %v989_v47 }
  0x9e   :  { %836 = vmatprep.subr.mxu0 %v756_v45 }
  0xa0   :  { %4846 = vmatmul.mubr.msk.f32.vlgmr.msra.gmra.mrb[0].mxu0 %vm65_vm1, %v4845_v49  ;;  %v993_v51 = vpop.permute.xlu1 %992  ;;  %v991_v52 = vpop.permute.xlu0 %990 }
  0xa1   :  { %837 = vmatpush1.msra.mxu0 %v757_v50  ;;  %900 = vmatprep.mubr.f32.mxu0 %v5076_v2  ;;  %v999_v58 = vsel %vm996_vm4, %v989_v47, %v991_v52  ;;  %v997_v3 = vsel %vm996_vm4, %v993_v51, %v995_v48  ;;  %v998_v5 = vsel %vm996_vm4, %v991_v52, %v993_v51  ;;  %v4865_v47 = vld [vmem:[%s6050_s2 + $0x40] sm:$0xff] }
  0xa2   :  { %907 = vmatprep.subr.mxu0 %v754_v53  ;;  %v5454_v52 = vld [vmem:[%s6051_s1] sm:$0xff]  ;;  %v5459_v53 = vld [vmem:[%s6051_s1 + $0x8] sm:$0xff] }
  0xa4   :  { %4847 = vmatmul.mubr.msk.f32.vlgmr.msra.gmra.mrb[2].mxu0 %vm65_vm1, %v4845_v49  ;;  %v1232_v56 = vpop.permute.xlu1 %1231  ;;  %v1230_v57 = vpop.permute.xlu0 %1229 }
  0xa5   :  { %908 = vmatpush1.msra.mxu0 %v755_v55  ;;  %971 = vmatprep.mubr.f32.mxu0 %v5076_v2  ;;  %v1243_v4 = vsel %vm1239_vm5, %v1230_v57, %v1232_v56 }
  0xa6   :  { %1008 = vmatprep.subr.mxu0 %v1001_v54 }
  0xa8   :  { %4848 = vmatmul.mubr.msk.f32.vlgmr.msra.gmra.mrb[4].mxu0 %vm65_vm1, %v4845_v49  ;;  %v1234_v60 = vpop.permute.xlu1 %1233  ;;  %v1228_v61 = vpop.permute.xlu0 %1227 }
  0xa9   :  { %1009 = vmatpush1.msra.mxu0 %v1002_v59  ;;  %1072 = vmatprep.mubr.f32.mxu0 %v5076_v2  ;;  %v1244_v10 = vsel %vm1239_vm5, %v1228_v61, %v1230_v57  ;;  %v1242_v14 = vsel %vm1239_vm5, %v1232_v56, %v1234_v60 }
  0xaa   :  { %1079 = vmatprep.subr.mxu0 %v999_v58  ;;  %v5466_v58 = vld [vmem:[%s6051_s1 + $0x10] sm:$0xff] }
  0xac   :  { %4850 = vmatmul.mubr.msk.f32.vlgmr.msra.gmra.mrb[0].mxu0 %vm65_vm1, %v4849_v62  ;;  %v1238_v0 = vpop.permute.xlu1 %1237  ;;  %v1236_v1 = vpop.permute.xlu0 %1235 }
  0xad   :  { %1080 = vmatpush1.msra.mxu0 %v1000_v63  ;;  %1143 = vmatprep.mubr.f32.mxu0 %v5076_v2  ;;  %v1241_v9 = vsel %vm1239_vm5, %v1234_v60, %v1236_v1  ;;  %v1245_v17 = vsel %vm1239_vm5, %v1238_v0, %v1228_v61  ;;  %v1240_v19 = vsel %vm1239_vm5, %v1236_v1, %v1238_v0  ;;  %v5471_v60 = vld [vmem:[%s6051_s1 + $0x18] sm:$0xff] }
  0xae   :  { %1150 = vmatprep.subr.mxu0 %v997_v3 }
  0xb0   :  { %4851 = vmatmul.mubr.msk.f32.vlgmr.msra.gmra.mrb[2].mxu0 %vm65_vm1, %v4849_v62  ;;  %v1475_v6 = vpop.permute.xlu1 %1474  ;;  %v1473_v7 = vpop.permute.xlu0 %1472 }
  0xb1   :  { %1151 = vmatpush1.msra.mxu0 %v998_v5  ;;  %1214 = vmatprep.mubr.f32.mxu0 %v5076_v2  ;;  %v1486_v18 = vsel %vm1482_vm6, %v1473_v7, %v1475_v6  ;;  %v5478_v5 = vld [vmem:[%s6051_s1 + $0x20] sm:$0xff] }
  0xb2   :  { %1251 = vmatprep.subr.mxu0 %v1243_v4 }
  0xb4   :  { %4852 = vmatmul.mubr.msk.f32.vlgmr.msra.gmra.mrb[4].mxu0 %vm65_vm1, %v4849_v62  ;;  %v1477_v11 = vpop.permute.xlu1 %1476  ;;  %v1471_v12 = vpop.permute.xlu0 %1470 }
  0xb5   :  { %1252 = vmatpush1.msra.mxu0 %v1244_v10  ;;  %1315 = vmatprep.mubr.f32.mxu0 %v5076_v2  ;;  %v1487_v23 = vsel %vm1482_vm6, %v1471_v12, %v1473_v7  ;;  %v1485_v27 = vsel %vm1482_vm6, %v1475_v6, %v1477_v11 }
  0xb6   :  { %1322 = vmatprep.subr.mxu0 %v1241_v9  ;;  %v5483_v9 = vld [vmem:[%s6051_s1 + $0x28] sm:$0xff] }
  0xb8   :  { %4854 = vmatmul.mubr.msk.f32.vlgmr.msra.gmra.mrb[0].mxu0 %vm65_vm1, %v4853_v13  ;;  %v1481_v15 = vpop.permute.xlu1 %1480  ;;  %v1479_v16 = vpop.permute.xlu0 %1478 }
  0xb9   :  { %1323 = vmatpush1.msra.mxu0 %v1242_v14  ;;  %1386 = vmatprep.mubr.f32.mxu0 %v5076_v2  ;;  %v1484_v22 = vsel %vm1482_vm6, %v1477_v11, %v1479_v16  ;;  %v1488_v29 = vsel %vm1482_vm6, %v1481_v15, %v1471_v12  ;;  %v1483_v31 = vsel %vm1482_vm6, %v1479_v16, %v1481_v15 }
  0xba   :  { %1393 = vmatprep.subr.mxu0 %v1245_v17 }
  0xbc   :  { %4855 = vmatmul.mubr.msk.f32.vlgmr.msra.gmra.mrb[2].mxu0 %vm65_vm1, %v4853_v13  ;;  %v1718_v20 = vpop.permute.xlu1 %1717  ;;  %v1716_v21 = vpop.permute.xlu0 %1715 }
  0xbd   :  { %1394 = vmatpush1.msra.mxu0 %v1240_v19  ;;  %1457 = vmatprep.mubr.f32.mxu0 %v5076_v2  ;;  %v1729_v30 = vsel %vm1725_vm7, %v1716_v21, %v1718_v20 }
  0xbe   :  { %1494 = vmatprep.subr.mxu0 %v1486_v18 }
  0xc0   :  { %4856 = vmatmul.mubr.msk.f32.vlgmr.msra.gmra.mrb[4].mxu0 %vm65_vm1, %v4853_v13  ;;  %v1714_v24 = vpop.permute.xlu0 %1713  ;;  %v1720_v26 = vpop.permute.xlu1 %1719 }
  0xc1   :  { %1495 = vmatpush1.msra.mxu0 %v1487_v23  ;;  %1558 = vmatprep.mubr.f32.mxu0 %v5076_v2  ;;  %v1730_v35 = vsel %vm1725_vm7, %v1714_v24, %v1716_v21  ;;  %v1728_v39 = vsel %vm1725_vm7, %v1718_v20, %v1720_v26 }
  0xc2   :  { %1565 = vmatprep.subr.mxu0 %v1484_v22 }
  0xc4   :  { %4858 = vmatmul.mubr.msk.f32.vlgmr.msra.gmra.mrb[0].mxu0 %vm65_vm1, %v4857_v25  ;;  %v1722_v28 = vpop.permute.xlu0 %1721  ;;  %v1724_v32 = vpop.permute.xlu1 %1723 }
  0xc5   :  { %1566 = vmatpush1.msra.mxu0 %v1485_v27  ;;  %1629 = vmatprep.mubr.f32.mxu0 %v5076_v2  ;;  %v1727_v34 = vsel %vm1725_vm7, %v1720_v26, %v1722_v28  ;;  %v1731_v40 = vsel %vm1725_vm7, %v1724_v32, %v1714_v24  ;;  %v1726_v42 = vsel %vm1725_vm7, %v1722_v28, %v1724_v32  ;;  %v5085_v24 = vmov 0   ;;  %v2229_v32 = vld [vmem:[%s6052_s3] sm:$0xff] }
  0xc6   :  { %1636 = vmatprep.subr.mxu0 %v1488_v29  ;;  %5010 = vset.pattern.permute.xlu0 %v5085_v24 }
  0xc7   :  { %5011 = vset.pattern.permute.xlu1 %v5085_v24 }
  0xc8   :  { %4859 = vmatmul.mubr.msk.f32.vlgmr.msra.gmra.mrb[2].mxu0 %vm65_vm1, %v4857_v25  ;;  %v1959_v33 = vpop.permute.xlu0 %1958  ;;  %v1961_v37 = vpop.permute.xlu1 %1960 }
  0xc9   :  { %1637 = vmatpush1.msra.mxu0 %v1483_v31  ;;  %1700 = vmatprep.mubr.f32.mxu0 %v5076_v2  ;;  %v1972_v41 = vsel %vm1968_vm8, %v1959_v33, %v1961_v37 }
  0xca   :  { %1737 = vmatprep.subr.mxu0 %v1729_v30 }
  0xcc   :  { %4860 = vmatmul.mubr.msk.f32.vlgmr.msra.gmra.mrb[4].mxu0 %vm65_vm1, %v4857_v25  ;;  %v1957_v38 = vpop.permute.xlu0 %1956  ;;  %v1963_v43 = vpop.permute.xlu1 %1962 }
  0xcd   :  { %1738 = vmatpush1.msra.mxu0 %v1730_v35  ;;  %1801 = vmatprep.mubr.f32.mxu0 %v5076_v2  ;;  %v1973_v46 = vsel %vm1968_vm8, %v1957_v38, %v1959_v33  ;;  %v1971_v49 = vsel %vm1968_vm8, %v1961_v37, %v1963_v43  ;;  %v2233_v35 = vld [vmem:[%s6053_s4] sm:$0xff] }
  0xce   :  { %1808 = vmatprep.subr.mxu0 %v1727_v34 }
  0xd0   :  { %4862 = vmatmul.mubr.msk.f32.vlgmr.msra.gmra.mrb[0].mxu0 %vm65_vm1, %v4861_v36  ;;  %v1965_v44 = vpop.permute.xlu0 %1964  ;;  %v1967_v48 = vpop.permute.xlu1 %1966 }
  0xd1   :  { %1809 = vmatpush1.msra.mxu0 %v1728_v39  ;;  %1872 = vmatprep.mubr.f32.mxu0 %v5076_v2  ;;  %v1970_v45 = vsel %vm1968_vm8, %v1963_v43, %v1965_v44  ;;  %v1974_v50 = vsel %vm1968_vm8, %v1967_v48, %v1957_v38  ;;  %v1969_v51 = vsel %vm1968_vm8, %v1965_v44, %v1967_v48 }
  0xd2   :  { %1879 = vmatprep.subr.mxu0 %v1731_v40 }
  0xd4   :  { %4863 = vmatmul.mubr.msk.f32.vlgmr.msra.gmra.mrb[2].mxu0 %vm65_vm1, %v4861_v36 }
  0xd5   :  { %1880 = vmatpush1.msra.mxu0 %v1726_v42  ;;  %1943 = vmatprep.mubr.f32.mxu0 %v5076_v2 }
  0xd6   :  { %1980 = vmatprep.subr.mxu0 %v1972_v41 }
  0xd8   :  { %4864 = vmatmul.mubr.msk.f32.vlgmr.msra.gmra.mrb[4].mxu0 %vm65_vm1, %v4861_v36 }
  0xd9   :  { %1981 = vmatpush1.msra.mxu0 %v1973_v46  ;;  %2044 = vmatprep.mubr.f32.mxu0 %v5076_v2 }
  0xda   :  { %2051 = vmatprep.subr.mxu0 %v1970_v45 }
  0xdc   :  { %4866 = vmatmul.mubr.msk.f32.vlgmr.msra.gmra.mrb[0].mxu0 %vm65_vm1, %v4865_v47 }
  0xdd   :  { %2052 = vmatpush1.msra.mxu0 %v1971_v49  ;;  %2115 = vmatprep.mubr.f32.mxu0 %v5076_v2 }
  0xde   :  { %2122 = vmatprep.subr.mxu0 %v1974_v50 }
  0xe0   :  { %4867 = vmatmul.mubr.msk.f32.vlgmr.msra.gmra.mrb[2].mxu0 %vm65_vm1, %v4865_v47 }
  0xe1   :  { %2123 = vmatpush1.msra.mxu0 %v1969_v51  ;;  %2186 = vmatprep.mubr.f32.mxu0 %v5076_v2 }
  0xe4   :  { %4868 = vmatmul.mubr.msk.f32.vlgmr.msra.gmra.mrb[4].mxu0 %vm65_vm1, %v4865_v47 }
 0x1af   :  { %v2046_v54 = vpop.f32.mrb[0].mxu0 }
 0x1b0   :  { %v2199_v55 = vmul.f32 %v2046_v54, %v5454_v52  ;;  %v2048_v56 = vpop.f32.mrb[1].mxu0 }
 0x1b1   :  { %v2200_v57 = vmul.f32 %v2048_v56, %v5459_v53 }
 0x1b2   :  { %v2212_v59 = vmul.f32 %v2199_v55, %v2046_v54 }
 0x1b3   :  { %v2205_v61 = vadd.f32 %v2200_v57, %v2199_v55  ;;  %v2213_v62 = vmul.f32 %v2200_v57, %v2048_v56  ;;  %v2117_v63 = vpop.f32.mrb[2].mxu0 }
 0x1b4   :  { %v2201_v0 = vmul.f32 %v2117_v63, %v5466_v58  ;;  %v2119_v1 = vpop.f32.mrb[3].mxu0 }
 0x1b5   :  { %v2218_v3 = vadd.f32 %v2213_v62, %v2212_v59  ;;  %v2202_v4 = vmul.f32 %v2119_v1, %v5471_v60 }
 0x1b6   :  { %v2206_v6 = vadd.f32 %v2205_v61, %v2201_v0  ;;  %v2214_v7 = vmul.f32 %v2201_v0, %v2117_v63 }
 0x1b7   :  { %v2215_v10 = vmul.f32 %v2202_v4, %v2119_v1  ;;  %v2188_v11 = vpop.f32.mrb[4].mxu0 }
 0x1b8   :  { %v2219_v12 = vadd.f32 %v2218_v3, %v2214_v7  ;;  %v2203_v13 = vmul.f32 %v2188_v11, %v5478_v5  ;;  %v2190_v14 = vpop.f32.mrb[5].mxu0  ;;  %v2207_v15 = vadd.f32 %v2206_v6, %v2202_v4 }
 0x1b9   :  { %v2204_v16 = vmul.f32 %v2190_v14, %v5483_v9 }
 0x1ba   :  { %v2216_v17 = vmul.f32 %v2203_v13, %v2188_v11  ;;  %v2208_v18 = vadd.f32 %v2207_v15, %v2203_v13  ;;  %v2220_v19 = vadd.f32 %v2219_v12, %v2215_v10 }
 0x1bb   :  { %v2217_v20 = vmul.f32 %v2204_v16, %v2190_v14 }
 0x1bc   :  { %v2209_v21 = vadd.f32 %v2208_v18, %v2204_v16  ;;  %v2221_v22 = vadd.f32 %v2220_v19, %v2216_v17 }
 0x1be   :  { %2210 = vadd.xlane.f32.xlu0 %v2209_v21  ;;  %v2222_v23 = vadd.f32 %v2221_v22, %v2217_v20 }
 0x1c0   :  { %2223 = vadd.xlane.f32.xlu1 %v2222_v23 }
 0x24b   :  { %v2211_v25 = vpop.xlane.xlu0 %2210 }
 0x24c   :  { %v2225_v26 = vmul.f32 0.001953125, %v2211_v25 }
 0x24d   :  { %v2224_v27 = vpop.xlane.xlu1 %2223 }
 0x24e   :  { %v2227_v28 = vmul.f32 %v2225_v26, %v2225_v26  ;;  %v2226_v29 = vmul.f32 0.001953125, %v2224_v27 }
 0x250   :  { %v2228_v30 = vsub.f32 %v2226_v29, %v2227_v28 }
 0x252   :  { %v2230_v31 = vadd.f32 1e-05, %v2228_v30 }
 0x254   :  { %5012 = vrsqrt.f32 %v2230_v31 }
 0x25e   :  { %v5013_v33 = vpop.eup %5012 }
 0x25f   :  { %v2232_v34 = vmul.f32 %v5013_v33, %v2229_v32 }
 0x261   :  { %2238 = vperm.xlu0 %5010, %v2232_v34   ;;  %v2234_v36 = vmul.f32 %v2232_v34, %v2225_v26 }
 0x263   :  { %v2235_v37 = vsub.f32 %v2233_v35, %v2234_v36 }
 0x265   :  { %2249 = vperm.xlu1 %5011, %v2235_v37  }
 0x2e0   :  { %v2239_v38 = vpop.permute.xlu0 %2238 }
 0x2e1   :  { %v2241_v39 = vmul.f32 %v2239_v38, %v2046_v54  ;;  %v2242_v40 = vmul.f32 %v2239_v38, %v2048_v56  ;;  %v2243_v41 = vmul.f32 %v2239_v38, %v2117_v63  ;;  %v2244_v42 = vmul.f32 %v2239_v38, %v2119_v1 }
 0x2e2   :  { %v2245_v43 = vmul.f32 %v2239_v38, %v2188_v11  ;;  %v2246_v44 = vmul.f32 %v2239_v38, %v2190_v14 }
 0x2e4   :  { %v2250_v45 = vpop.permute.xlu1 %2249 }
 0x2e5   :  { %v5493_v46 = vadd.f32 %v2250_v45, %v2241_v39  ;;  %v5495_v47 = vadd.f32 %v2250_v45, %v2242_v40  ;;  %v5497_v48 = vadd.f32 %v2250_v45, %v2243_v41  ;;  %v5499_v49 = vadd.f32 %v2250_v45, %v2244_v42 }
 0x2e6   :  { %v5501_v50 = vadd.f32 %v2250_v45, %v2245_v43  ;;  %v5503_v51 = vadd.f32 %v2250_v45, %v2246_v44 }
 0x2e7   :  { %v5506_v54 = vmul.f32 0.70710677, %v5493_v46  ;;  %v5509_v55 = vmul.f32 0.70710677, %v5495_v47  ;;  %v5512_v56 = vmul.f32 0.70710677, %v5497_v48 }
 0x2e8   :  { %v5515_v57 = vmul.f32 0.70710677, %v5499_v49  ;;  %v5518_v59 = vmul.f32 0.70710677, %v5501_v50  ;;  %v5521_v61 = vmul.f32 0.70710677, %v5503_v51 }
 0x2e9   :  { %v2270_v62 = vand.u32 2147483647, %v5506_v54  ;;  %v2271_v63 = vand.u32 2147483647, %v5509_v55  ;;  %v2272_v0 = vand.u32 2147483647, %v5512_v56 }
 0x2ea   :  { %v2273_v1 = vand.u32 2147483647, %v5515_v57  ;;  %v2274_v3 = vand.u32 2147483647, %v5518_v59  ;;  %v2275_v4 = vand.u32 2147483647, %v5521_v61 }
 0x2eb   :  { %v2276_v6 = vmul.f32 0.3275911, %v2270_v62  ;;  %v2277_v7 = vmul.f32 0.3275911, %v2271_v63  ;;  %v2278_v10 = vmul.f32 0.3275911, %v2272_v0 }
 0x2ec   :  { %v2279_v11 = vmul.f32 0.3275911, %v2273_v1  ;;  %v2280_v12 = vmul.f32 0.3275911, %v2274_v3  ;;  %v2281_v13 = vmul.f32 0.3275911, %v2275_v4 }
 0x2ed   :  { %v2282_v14 = vadd.f32 1.0, %v2276_v6  ;;  %v2283_v15 = vadd.f32 1.0, %v2277_v7  ;;  %v2284_v16 = vadd.f32 1.0, %v2278_v10  ;;  %v2366_v21 = vsub.f32 0.0, %v2270_v62 }
 0x2ee   :  { %v2285_v17 = vadd.f32 1.0, %v2279_v11  ;;  %v2286_v18 = vadd.f32 1.0, %v2280_v12  ;;  %v2287_v19 = vadd.f32 1.0, %v2281_v13  ;;  %v2367_v22 = vsub.f32 0.0, %v2271_v63 }
 0x2ef   :  { %5014 = vrcp.f32 %v2282_v14  ;;  %v2368_v25 = vsub.f32 0.0, %v2272_v0  ;;  %v2369_v28 = vsub.f32 0.0, %v2273_v1  ;;  %v2370_v32 = vsub.f32 0.0, %v2274_v3 }
 0x2f0   :  { %5016 = vrcp.f32 %v2283_v15  ;;  %v2371_v33 = vsub.f32 0.0, %v2275_v4  ;;  %v2372_v37 = vmul.f32 %v2366_v21, %v2270_v62  ;;  %v2373_v38 = vmul.f32 %v2367_v22, %v2271_v63 }
 0x2f1   :  { %5018 = vrcp.f32 %v2284_v16  ;;  %v2374_v43 = vmul.f32 %v2368_v25, %v2272_v0  ;;  %v2375_v7 = vmul.f32 %v2369_v28, %v2273_v1  ;;  %v2376_v13 = vmul.f32 %v2370_v32, %v2274_v3 }
 0x2f2   :  { %5020 = vrcp.f32 %v2285_v17  ;;  %v2380_v21 = vmul.f32 1.442695, %v2373_v38  ;;  %vm2402_vm9 = vcmp.ge.f32.partialorder %v5506_v54, 0.0  ;;  %vm2403_vm10 = vcmp.ge.f32.partialorder %v5509_v55, 0.0 }
 0x2f3   :  { %5022 = vrcp.f32 %v2286_v18  ;;  %vm2405_vm11 = vcmp.ge.f32.partialorder %v5515_v57, 0.0  ;;  %vm2407_vm12 = vcmp.ge.f32.partialorder %v5521_v61, 0.0  ;;  %vm2404_vm13 = vcmp.ge.f32.partialorder %v5512_v56, 0.0 }
 0x2f4   :  { %5024 = vrcp.f32 %v2287_v19  ;;  %vm2406_vm14 = vcmp.ge.f32.partialorder %v5518_v59, 0.0 }
 0x2f9   :  { %v5015_v20 = vpop.eup %5014 }
 0x2fa   :  { %v5017_v23 = vpop.eup %5016  ;;  %v2294_v24 = vmul.f32 %v5015_v20, %v2282_v14 }
 0x2fb   :  { %v5019_v26 = vpop.eup %5018  ;;  %v2295_v27 = vmul.f32 %v5017_v23, %v2283_v15  ;;  %v2377_v15 = vmul.f32 %v2371_v33, %v2275_v4 }
 0x2fc   :  { %v5021_v29 = vpop.eup %5020  ;;  %v2296_v30 = vmul.f32 %v5019_v26, %v2284_v16  ;;  %v2300_v31 = vsub.f32 2.0, %v2294_v24  ;;  %v2382_v24 = vmul.f32 1.442695, %v2374_v43 }
 0x2fd   :  { %v5023_v34 = vpop.eup %5022  ;;  %v2297_v35 = vmul.f32 %v5021_v29, %v2285_v17  ;;  %v2301_v36 = vsub.f32 2.0, %v2295_v27  ;;  %v2384_v27 = vmul.f32 1.442695, %v2375_v7 }
 0x2fe   :  { %v5025_v39 = vpop.eup %5024  ;;  %v2298_v40 = vmul.f32 %v5023_v34, %v2286_v18  ;;  %v2302_v41 = vsub.f32 2.0, %v2296_v30  ;;  %v5529_v42 = vmul.f32 %v5015_v20, %v2300_v31  ;;  %v2378_v18 = vmul.f32 1.442695, %v2372_v37 }
 0x2ff   :  { %v2299_v44 = vmul.f32 %v5025_v39, %v2287_v19  ;;  %v2303_v45 = vsub.f32 2.0, %v2297_v35  ;;  %v5531_v6 = vmul.f32 %v5017_v23, %v2301_v36  ;;  %v2388_v31 = vmul.f32 1.442695, %v2377_v15 }
 0x300   :  { %v2304_v10 = vsub.f32 2.0, %v2298_v40  ;;  %v5533_v11 = vmul.f32 %v5019_v26, %v2302_v41  ;;  %v2312_v12 = vmul.f32 1.0614054, %v5529_v42  ;;  %5026 = vpow2.f32 %v2378_v18 }
 0x301   :  { %v2305_v14 = vsub.f32 2.0, %v2299_v44  ;;  %v5536_v62 = vmul.f32 %v5021_v29, %v2303_v45  ;;  %v2313_v63 = vmul.f32 1.0614054, %v5531_v6  ;;  %5028 = vpow2.f32 %v2380_v21 }
 0x302   :  { %v5539_v16 = vmul.f32 %v5023_v34, %v2304_v10  ;;  %v2314_v0 = vmul.f32 1.0614054, %v5533_v11  ;;  %v2318_v17 = vadd.f32 -1.4531521, %v2312_v12  ;;  %5030 = vpow2.f32 %v2382_v24 }
 0x303   :  { %v5542_v19 = vmul.f32 %v5025_v39, %v2305_v14  ;;  %v2315_v1 = vmul.f32 1.0614054, %v5536_v62  ;;  %v2319_v20 = vadd.f32 -1.4531521, %v2313_v63  ;;  %5032 = vpow2.f32 %v2384_v27 }
 0x304   :  { %v2316_v3 = vmul.f32 1.0614054, %v5539_v16  ;;  %v2320_v22 = vadd.f32 -1.4531521, %v2314_v0  ;;  %v2324_v23 = vmul.f32 %v2318_v17, %v5529_v42  ;;  %v2386_v12 = vmul.f32 1.442695, %v2376_v13 }
 0x305   :  { %v2317_v4 = vmul.f32 1.0614054, %v5542_v19  ;;  %v2321_v25 = vadd.f32 -1.4531521, %v2315_v1  ;;  %v2325_v26 = vmul.f32 %v2319_v20, %v5531_v6  ;;  %5034 = vpow2.f32 %v2388_v31 }
 0x306   :  { %v2322_v28 = vadd.f32 -1.4531521, %v2316_v3  ;;  %v2326_v29 = vmul.f32 %v2320_v22, %v5533_v11  ;;  %v2330_v30 = vadd.f32 1.4214138, %v2324_v23  ;;  %5036 = vpow2.f32 %v2386_v12 }
 0x307   :  { %v2323_v32 = vadd.f32 -1.4531521, %v2317_v4  ;;  %v2327_v33 = vmul.f32 %v2321_v25, %v5536_v62  ;;  %v2331_v34 = vadd.f32 1.4214138, %v2325_v26 }
 0x308   :  { %v2328_v35 = vmul.f32 %v2322_v28, %v5539_v16  ;;  %v2332_v36 = vadd.f32 1.4214138, %v2326_v29  ;;  %v2336_v37 = vmul.f32 %v2330_v30, %v5529_v42 }
 0x309   :  { %v2329_v38 = vmul.f32 %v2323_v32, %v5542_v19  ;;  %v2333_v39 = vadd.f32 1.4214138, %v2327_v33  ;;  %v2337_v40 = vmul.f32 %v2331_v34, %v5531_v6 }
 0x30a   :  { %v2334_v41 = vadd.f32 1.4214138, %v2328_v35  ;;  %v2338_v43 = vmul.f32 %v2332_v36, %v5533_v11  ;;  %v2342_v44 = vadd.f32 -0.28449672, %v2336_v37  ;;  %v5027_v25 = vpop.eup %5026 }
 0x30b   :  { %v2335_v45 = vadd.f32 1.4214138, %v2329_v38  ;;  %v2339_v7 = vmul.f32 %v2333_v39, %v5536_v62  ;;  %v2343_v10 = vadd.f32 -0.28449672, %v2337_v40  ;;  %v5029_v29 = vpop.eup %5028 }
 0x30c   :  { %v2340_v14 = vmul.f32 %v2334_v41, %v5539_v16  ;;  %v2344_v63 = vadd.f32 -0.28449672, %v2338_v43  ;;  %v2348_v15 = vmul.f32 %v2342_v44, %v5529_v42  ;;  %v5031_v33 = vpop.eup %5030 }
 0x30d   :  { %v2341_v0 = vmul.f32 %v2335_v45, %v5542_v19  ;;  %v2345_v17 = vadd.f32 -0.28449672, %v2339_v7  ;;  %v2349_v18 = vmul.f32 %v2343_v10, %v5531_v6  ;;  %v5033_v37 = vpop.eup %5032 }
 0x30e   :  { %v2346_v1 = vadd.f32 -0.28449672, %v2340_v14  ;;  %v2350_v20 = vmul.f32 %v2344_v63, %v5533_v11  ;;  %v2354_v21 = vadd.f32 0.2548296, %v2348_v15 }
 0x30f   :  { %v2347_v3 = vadd.f32 -0.28449672, %v2341_v0  ;;  %v2351_v22 = vmul.f32 %v2345_v17, %v5536_v62  ;;  %v2355_v23 = vadd.f32 0.2548296, %v2349_v18  ;;  %v5035_v43 = vpop.eup %5034 }
 0x310   :  { %v2352_v13 = vmul.f32 %v2346_v1, %v5539_v16  ;;  %v2356_v24 = vadd.f32 0.2548296, %v2350_v20  ;;  %v2360_v4 = vmul.f32 %v2354_v21, %v5529_v42  ;;  %v5037_v14 = vpop.eup %5036  ;;  %v2259_v1 = vmul.f32 0.5, %v5495_v47 }
 0x311   :  { %v2353_v26 = vmul.f32 %v2347_v3, %v5542_v19  ;;  %v2357_v27 = vadd.f32 0.2548296, %v2351_v22  ;;  %v2361_v28 = vmul.f32 %v2355_v23, %v5531_v6  ;;  %v2261_v47 = vmul.f32 0.5, %v5499_v49 }
 0x312   :  { %v2358_v30 = vadd.f32 0.2548296, %v2352_v13  ;;  %v2362_v31 = vmul.f32 %v2356_v24, %v5533_v11  ;;  %v2390_v32 = vmul.f32 %v5027_v25, %v2360_v4 }
 0x313   :  { %v2359_v34 = vadd.f32 0.2548296, %v2353_v26  ;;  %v2363_v35 = vmul.f32 %v2357_v27, %v5536_v62  ;;  %v2391_v36 = vmul.f32 %v5029_v29, %v2361_v28  ;;  %v2258_v62 = vmul.f32 0.5, %v5493_v46 }
 0x314   :  { %v2392_v38 = vmul.f32 %v5031_v33, %v2362_v31  ;;  %v2396_v39 = vsub.f32 1.0, %v2390_v32  ;;  %v2364_v6 = vmul.f32 %v2358_v30, %v5539_v16  ;;  %v2263_v46 = vmul.f32 0.5, %v5503_v51  ;;  %v2458_v32 = vld [vmem:[%s6054_s5] sm:$0xff] }
 0x315   :  { %v2365_v42 = vmul.f32 %v2359_v34, %v5542_v19  ;;  %v2393_v40 = vmul.f32 %v5033_v37, %v2363_v35  ;;  %v2397_v41 = vsub.f32 1.0, %v2391_v36  ;;  %v2260_v26 = vmul.f32 0.5, %v5497_v48 }
 0x316   :  { %v2398_v44 = vsub.f32 1.0, %v2392_v38  ;;  %v2408_v45 = vsub.f32 0.0, %v2396_v39  ;;  %v2394_v17 = vmul.f32 %v5037_v14, %v2364_v6  ;;  %v2262_v28 = vmul.f32 0.5, %v5501_v50 }
 0x317   :  { %v2395_v7 = vmul.f32 %v5035_v43, %v2365_v42  ;;  %v2399_v11 = vsub.f32 1.0, %v2393_v40  ;;  %v2409_v10 = vsub.f32 0.0, %v2397_v41 }
 0x318   :  { %v2414_v12 = vsel %vm2402_vm9, %v2396_v39, %v2408_v45  ;;  %v2410_v16 = vsub.f32 0.0, %v2398_v44  ;;  %v2400_v23 = vsub.f32 1.0, %v2394_v17 }
 0x319   :  { %v2401_v63 = vsub.f32 1.0, %v2395_v7  ;;  %v2411_v19 = vsub.f32 0.0, %v2399_v11  ;;  %v2415_v15 = vsel %vm2403_vm10, %v2397_v41, %v2409_v10  ;;  %v2420_v0 = vadd.f32 1.0, %v2414_v12  ;;  %v4869_v7 = vld [vmem:[%s6054_s5 + $0x20] sm:$0xff] }
 0x31a   :  { %v2421_v18 = vadd.f32 1.0, %v2415_v15  ;;  %v2416_v57 = vsel %vm2404_vm13, %v2398_v44, %v2410_v16  ;;  %v2412_v4 = vsub.f32 0.0, %v2400_v23 }
 0x31b   :  { %v2413_v20 = vsub.f32 0.0, %v2401_v63  ;;  %v2417_v54 = vsel %vm2405_vm11, %v2399_v11, %v2411_v19  ;;  %v2426_v21 = vmul.f32 %v2420_v0, %v2258_v62  ;;  %v2422_v61 = vadd.f32 1.0, %v2416_v57  ;;  %v4876_v0 = vld [vmem:[%s6054_s5 + $0x8] sm:$0xff] }
 0x31c   :  { %v2427_v3 = vmul.f32 %v2421_v18, %v2259_v1  ;;  %v2423_v13 = vadd.f32 1.0, %v2417_v54  ;;  %v2418_v27 = vsel %vm2406_vm14, %v2400_v23, %v2412_v4  ;;  %v4880_v23 = vld [vmem:[%s6054_s5 + $0x10] sm:$0xff] }
 0x31d   :  { %v2419_v55 = vsel %vm2407_vm12, %v2401_v63, %v2413_v20  ;;  %v5580_v22 = vmul.f32 %v2426_v21, %v5454_v52  ;;  %v2428_v49 = vmul.f32 %v2422_v61, %v2260_v26 }
 0x31e   :  { %v2425_v24 = vadd.f32 1.0, %v2419_v55  ;;  %v5588_v56 = vmul.f32 %v2427_v3, %v5459_v53  ;;  %v2429_v52 = vmul.f32 %v2423_v13, %v2261_v47 }
 0x31f   :  { %2891 = vrot.lane.b32.xlu0 %v5580_v22, %s5078_s18  ;;  %2440 = vrot.lane.b32.xlu1 %v5580_v22, %s5077_s9  ;;  %v5607_v48 = vmul.f32 %v2428_v49, %v5466_v58  ;;  %v4884_v49 = vld [vmem:[%s6054_s5 + $0x18] sm:$0xff] }
 0x320   :  { %v2431_v51 = vmul.f32 %v2425_v24, %v2263_v46  ;;  %v5600_v53 = vmul.f32 %v2429_v52, %v5471_v60 }
 0x322   :  { %v5591_v25 = vmul.f32 %v2431_v51, %v5483_v9  ;;  %v2424_v9 = vadd.f32 1.0, %v2418_v27 }
 0x323   :  { %2442 = vrot.lane.b32.xlu1 %v5588_v56, %s5077_s9 }
 0x324   :  { %2901 = vrot.lane.b32.xlu0 %v5591_v25, %s5078_s18  ;;  %v2430_v60 = vmul.f32 %v2424_v9, %v2262_v28 }
 0x326   :  { %v5619_v59 = vmul.f32 %v2430_v60, %v5478_v5 }
 0x327   :  { %2450 = vrot.lane.b32.xlu1 %v5591_v25, %s5077_s9 }
 0x328   :  { %2897 = vrot.lane.b32.xlu0 %v5600_v53, %s5078_s18 }
 0x32b   :  { %2444 = vrot.lane.b32.xlu1 %v5607_v48, %s5077_s9 }
 0x32c   :  { %3133 = vrot.lane.b32.xlu0 %v5580_v22, %s5079_s19 }
 0x32f   :  { %2446 = vrot.lane.b32.xlu1 %v5600_v53, %s5077_s9 }
 0x330   :  { %3143 = vrot.lane.b32.xlu0 %v5591_v25, %s5079_s19 }
 0x333   :  { %2448 = vrot.lane.b32.xlu1 %v5619_v59, %s5077_s9 }
 0x334   :  { %3139 = vrot.lane.b32.xlu0 %v5600_v53, %s5079_s19 }
 0x337   :  { %2893 = vrot.lane.b32.xlu1 %v5588_v56, %s5078_s18 }
 0x338   :  { %3375 = vrot.lane.b32.xlu0 %v5580_v22, %s5080_s20 }
 0x33b   :  { %2895 = vrot.lane.b32.xlu1 %v5607_v48, %s5078_s18 }
 0x33c   :  { %3385 = vrot.lane.b32.xlu0 %v5591_v25, %s5080_s20 }
 0x33f   :  { %2899 = vrot.lane.b32.xlu1 %v5619_v59, %s5078_s18 }
 0x340   :  { %3381 = vrot.lane.b32.xlu0 %v5600_v53, %s5080_s20 }
 0x343   :  { %3135 = vrot.lane.b32.xlu1 %v5588_v56, %s5079_s19 }
 0x344   :  { %3619 = vrot.lane.b32.xlu0 %v5588_v56, %s5081_s21 }
 0x347   :  { %3137 = vrot.lane.b32.xlu1 %v5607_v48, %s5079_s19 }
 0x348   :  { %3617 = vrot.lane.b32.xlu0 %v5580_v22, %s5081_s21 }
 0x34b   :  { %3141 = vrot.lane.b32.xlu1 %v5619_v59, %s5079_s19 }
 0x34c   :  { %3625 = vrot.lane.b32.xlu0 %v5619_v59, %s5081_s21 }
 0x34f   :  { %3377 = vrot.lane.b32.xlu1 %v5588_v56, %s5080_s20 }
 0x350   :  { %3861 = vrot.lane.b32.xlu0 %v5588_v56, %s5082_s22 }
 0x353   :  { %3379 = vrot.lane.b32.xlu1 %v5607_v48, %s5080_s20 }
 0x354   :  { %3859 = vrot.lane.b32.xlu0 %v5580_v22, %s5082_s22 }
 0x357   :  { %3383 = vrot.lane.b32.xlu1 %v5619_v59, %s5080_s20 }
 0x358   :  { %3867 = vrot.lane.b32.xlu0 %v5619_v59, %s5082_s22 }
 0x35b   :  { %3621 = vrot.lane.b32.xlu1 %v5607_v48, %s5081_s21 }
 0x35c   :  { %4103 = vrot.lane.b32.xlu0 %v5588_v56, %s5083_s23 }
 0x35f   :  { %3623 = vrot.lane.b32.xlu1 %v5600_v53, %s5081_s21 }
 0x360   :  { %4101 = vrot.lane.b32.xlu0 %v5580_v22, %s5083_s23 }
 0x363   :  { %3627 = vrot.lane.b32.xlu1 %v5591_v25, %s5081_s21 }
 0x364   :  { %4109 = vrot.lane.b32.xlu0 %v5619_v59, %s5083_s23 }
 0x367   :  { %3863 = vrot.lane.b32.xlu1 %v5607_v48, %s5082_s22 }
 0x368   :  { %4345 = vrot.lane.b32.xlu0 %v5588_v56, %s5084_s24 }
 0x36b   :  { %3865 = vrot.lane.b32.xlu1 %v5600_v53, %s5082_s22 }
 0x36c   :  { %4343 = vrot.lane.b32.xlu0 %v5580_v22, %s5084_s24 }
 0x36f   :  { %3869 = vrot.lane.b32.xlu1 %v5591_v25, %s5082_s22 }
 0x370   :  { %4351 = vrot.lane.b32.xlu0 %v5619_v59, %s5084_s24 }
 0x373   :  { %4105 = vrot.lane.b32.xlu1 %v5607_v48, %s5083_s23 }
 0x377   :  { %4107 = vrot.lane.b32.xlu1 %v5600_v53, %s5083_s23 }
 0x37b   :  { %4111 = vrot.lane.b32.xlu1 %v5591_v25, %s5083_s23 }
 0x37f   :  { %4347 = vrot.lane.b32.xlu1 %v5607_v48, %s5084_s24 }
 0x383   :  { %4349 = vrot.lane.b32.xlu1 %v5600_v53, %s5084_s24 }
 0x387   :  { %4353 = vrot.lane.b32.xlu1 %v5591_v25, %s5084_s24 }
 0x391   :  { %v2892_v58 = vpop.permute.xlu0 %2891  ;;  %v2441_v5 = vpop.permute.xlu1 %2440 }
 0x395   :  { %v2443_v50 = vpop.permute.xlu1 %2442 }
 0x396   :  { %v2902_v29 = vpop.permute.xlu0 %2901  ;;  %v2456_v30 = vsel %vm57_vm0, %v2441_v5, %v2443_v50 }
 0x397   :  { %2462 = vmatprep.subr.mxu1 %v2456_v30  ;;  %v2908_v14 = vsel %vm510_vm2, %v2902_v29, %v2892_v58  ;;  %v4888_v30 = vld [vmem:[%s6054_s5 + $0x28] sm:$0xff] }
 0x399   :  { %v2451_v31 = vpop.permute.xlu1 %2450 }
 0x39a   :  { %v2898_v33 = vpop.permute.xlu0 %2897  ;;  %v2457_v34 = vsel %vm57_vm0, %v2451_v31, %v2441_v5 }
 0x39b   :  { %2463 = vmatpush1.msra.mxu1 %v2457_v34 }
 0x39c   :  { %4870 = vmatmul.mubr.msk.f32.vlgmr.msra.gmra.mrb[0].mxu1 %vm65_vm1, %v2458_v32 }
 0x39d   :  { %v2445_v35 = vpop.permute.xlu1 %2444  ;;  %2597 = vmatprep.mubr.f32.mxu1 %v5076_v2 }
 0x39e   :  { %v3134_v36 = vpop.permute.xlu0 %3133  ;;  %v2455_v42 = vsel %vm57_vm0, %v2443_v50, %v2445_v35 }
 0x3a1   :  { %v2447_v37 = vpop.permute.xlu1 %2446 }
 0x3a2   :  { %v5706_v38 = vpop.permute.xlu0 %3143  ;;  %v2454_v39 = vsel %vm57_vm0, %v2445_v35, %v2447_v37 }
 0x3a3   :  { %2533 = vmatprep.subr.mxu1 %v2454_v39  ;;  %v3150_v46 = vsel %vm753_vm3, %v5706_v38, %v3134_v36 }
 0x3a4   :  { %2534 = vmatpush1.msra.mxu1 %v2455_v42 }
 0x3a5   :  { %4871 = vmatmul.mubr.msk.f32.vlgmr.msra.gmra.mrb[2].mxu1 %vm65_vm1, %v2458_v32  ;;  %v2449_v40 = vpop.permute.xlu1 %2448 }
 0x3a6   :  { %v5713_v41 = vpop.permute.xlu0 %3139  ;;  %v2453_v43 = vsel %vm57_vm0, %v2447_v37, %v2449_v40  ;;  %v2452_v6 = vsel %vm57_vm0, %v2449_v40, %v2451_v31  ;;  %2668 = vmatprep.mubr.f32.mxu1 %v5076_v2 }
 0x3a7   :  { %2604 = vmatprep.subr.mxu1 %v2452_v6 }
 0x3a8   :  { %2605 = vmatpush1.msra.mxu1 %v2453_v43 }
 0x3a9   :  { %4872 = vmatmul.mubr.msk.f32.vlgmr.msra.gmra.mrb[4].mxu1 %vm65_vm1, %v2458_v32  ;;  %2678 = vmatprep.subr.mxu1 %v5588_v56  ;;  %v2894_v44 = vpop.permute.xlu1 %2893 }
 0x3aa   :  { %v5722_v45 = vpop.permute.xlu0 %3375  ;;  %2679 = vmatpush1.msra.mxu1 %v5580_v22  ;;  %2742 = vmatprep.mubr.f32.mxu1 %v5076_v2  ;;  %v2907_v12 = vsel %vm510_vm2, %v2892_v58, %v2894_v44 }
 0x3ab   :  { %2749 = vmatprep.subr.mxu1 %v5600_v53 }
 0x3ad   :  { %4873 = vmatmul.mubr.msk.f32.vlgmr.msra.gmra.mrb[0].mxu1 %vm65_vm1, %v4869_v7  ;;  %v2896_v11 = vpop.permute.xlu1 %2895 }
 0x3ae   :  { %2750 = vmatpush1.msra.mxu1 %v5607_v48  ;;  %2813 = vmatprep.mubr.f32.mxu1 %v5076_v2  ;;  %v5733_v10 = vpop.permute.xlu0 %3385  ;;  %v2905_v15 = vsel %vm510_vm2, %v2896_v11, %v2898_v33  ;;  %v2906_v17 = vsel %vm510_vm2, %v2894_v44, %v2896_v11 }
 0x3af   :  { %2820 = vmatprep.subr.mxu1 %v5591_v25  ;;  %v3392_v4 = vsel %vm996_vm4, %v5733_v10, %v5722_v45 }
 0x3b1   :  { %4874 = vmatmul.mubr.msk.f32.vlgmr.msra.gmra.mrb[2].mxu1 %vm65_vm1, %v4869_v7  ;;  %v2900_v62 = vpop.permute.xlu1 %2899 }
 0x3b2   :  { %2821 = vmatpush1.msra.mxu1 %v5619_v59  ;;  %2884 = vmatprep.mubr.f32.mxu1 %v5076_v2  ;;  %v5743_v63 = vpop.permute.xlu0 %3381  ;;  %v2903_v18 = vsel %vm510_vm2, %v2900_v62, %v2902_v29  ;;  %v2904_v20 = vsel %vm510_vm2, %v2898_v33, %v2900_v62 }
 0x3b3   :  { %2914 = vmatprep.subr.mxu1 %v2907_v12 }
 0x3b5   :  { %4875 = vmatmul.mubr.msk.f32.vlgmr.msra.gmra.mrb[4].mxu1 %vm65_vm1, %v4869_v7  ;;  %v3136_v19 = vpop.permute.xlu1 %3135 }
 0x3b6   :  { %2915 = vmatpush1.msra.mxu1 %v2908_v14  ;;  %2978 = vmatprep.mubr.f32.mxu1 %v5076_v2  ;;  %v3620_v1 = vpop.permute.xlu0 %3619  ;;  %v3149_v21 = vsel %vm753_vm3, %v3134_v36, %v3136_v19 }
 0x3b7   :  { %2985 = vmatprep.subr.mxu1 %v2905_v15 }
 0x3b9   :  { %4877 = vmatmul.mubr.msk.f32.vlgmr.msra.gmra.mrb[0].mxu1 %vm65_vm1, %v4876_v0  ;;  %v3138_v16 = vpop.permute.xlu1 %3137 }
 0x3ba   :  { %2986 = vmatpush1.msra.mxu1 %v2906_v17  ;;  %3049 = vmatprep.mubr.f32.mxu1 %v5076_v2  ;;  %v3618_v55 = vpop.permute.xlu0 %3617  ;;  %v3147_v22 = vsel %vm753_vm3, %v3138_v16, %v5713_v41  ;;  %v3148_v57 = vsel %vm753_vm3, %v3136_v19, %v3138_v16 }
 0x3bb   :  { %3056 = vmatprep.subr.mxu1 %v2903_v18  ;;  %v3633_v58 = vsel %vm1239_vm5, %v3618_v55, %v3620_v1 }
 0x3bd   :  { %4878 = vmatmul.mubr.msk.f32.vlgmr.msra.gmra.mrb[2].mxu1 %vm65_vm1, %v4876_v0  ;;  %v3142_v54 = vpop.permute.xlu1 %3141 }
 0x3be   :  { %3057 = vmatpush1.msra.mxu1 %v2904_v20  ;;  %3120 = vmatprep.mubr.f32.mxu1 %v5076_v2  ;;  %v3145_v24 = vsel %vm753_vm3, %v3142_v54, %v5706_v38  ;;  %v3626_v47 = vpop.permute.xlu0 %3625  ;;  %v3146_v51 = vsel %vm753_vm3, %v5713_v41, %v3142_v54  ;;  %v4892_v41 = vld [vmem:[%s6054_s5 + $0x30] sm:$0xff] }
 0x3bf   :  { %3156 = vmatprep.subr.mxu1 %v3149_v21 }
 0x3c1   :  { %4879 = vmatmul.mubr.msk.f32.vlgmr.msra.gmra.mrb[4].mxu1 %vm65_vm1, %v4876_v0  ;;  %v3378_v3 = vpop.permute.xlu1 %3377 }
 0x3c2   :  { %3157 = vmatpush1.msra.mxu1 %v3150_v46  ;;  %3220 = vmatprep.mubr.f32.mxu1 %v5076_v2  ;;  %v3391_v56 = vsel %vm996_vm4, %v5722_v45, %v3378_v3  ;;  %v3862_v52 = vpop.permute.xlu0 %3861  ;;  %v4900_v46 = vld [vmem:[%s6054_s5 + $0x40] sm:$0xff] }
 0x3c3   :  { %3227 = vmatprep.subr.mxu1 %v3147_v22 }
 0x3c5   :  { %4881 = vmatmul.mubr.msk.f32.vlgmr.msra.gmra.mrb[0].mxu1 %vm65_vm1, %v4880_v23  ;;  %v3380_v13 = vpop.permute.xlu1 %3379 }
 0x3c6   :  { %3228 = vmatpush1.msra.mxu1 %v3148_v57  ;;  %3291 = vmatprep.mubr.f32.mxu1 %v5076_v2  ;;  %v3389_v26 = vsel %vm996_vm4, %v3380_v13, %v5743_v63  ;;  %v3390_v27 = vsel %vm996_vm4, %v3378_v3, %v3380_v13  ;;  %v3860_v48 = vpop.permute.xlu0 %3859  ;;  %v5064_v13 = vld [vmem:[%s6051_s1] sm:$0xff] }
 0x3c7   :  { %3298 = vmatprep.subr.mxu1 %v3145_v24  ;;  %v3875_v38 = vsel %vm1482_vm6, %v3860_v48, %v3862_v52 }
 0x3c9   :  { %4882 = vmatmul.mubr.msk.f32.vlgmr.msra.gmra.mrb[2].mxu1 %vm65_vm1, %v4880_v23  ;;  %v3384_v61 = vpop.permute.xlu1 %3383 }
 0x3ca   :  { %3299 = vmatpush1.msra.mxu1 %v3146_v51  ;;  %3362 = vmatprep.mubr.f32.mxu1 %v5076_v2  ;;  %v3387_v9 = vsel %vm996_vm4, %v3384_v61, %v5733_v10  ;;  %v3388_v28 = vsel %vm996_vm4, %v5743_v63, %v3384_v61  ;;  %v3868_v5 = vpop.permute.xlu0 %3867  ;;  %v4896_v63 = vld [vmem:[%s6054_s5 + $0x38] sm:$0xff]  ;;  %v5065_v51 = vld [vmem:[%s6051_s1 + $0x8] sm:$0xff] }
 0x3cb   :  { %3398 = vmatprep.subr.mxu1 %v3391_v56 }
 0x3cd   :  { %4883 = vmatmul.mubr.msk.f32.vlgmr.msra.gmra.mrb[4].mxu1 %vm65_vm1, %v4880_v23  ;;  %v3622_v25 = vpop.permute.xlu1 %3621 }
 0x3ce   :  { %3399 = vmatpush1.msra.mxu1 %v3392_v4  ;;  %3462 = vmatprep.mubr.f32.mxu1 %v5076_v2  ;;  %v3632_v59 = vsel %vm1239_vm5, %v3620_v1, %v3622_v25  ;;  %v4104_v34 = vpop.permute.xlu0 %4103 }
 0x3cf   :  { %3469 = vmatprep.subr.mxu1 %v3389_v26 }
 0x3d1   :  { %4885 = vmatmul.mubr.msk.f32.vlgmr.msra.gmra.mrb[0].mxu1 %vm65_vm1, %v4884_v49  ;;  %v3624_v53 = vpop.permute.xlu1 %3623 }
 0x3d2   :  { %3470 = vmatpush1.msra.mxu1 %v3390_v27  ;;  %3533 = vmatprep.mubr.f32.mxu1 %v5076_v2  ;;  %v3630_v29 = vsel %vm1239_vm5, %v3624_v53, %v3626_v47  ;;  %v3631_v31 = vsel %vm1239_vm5, %v3622_v25, %v3624_v53  ;;  %v4102_v39 = vpop.permute.xlu0 %4101  ;;  %v5067_v27 = vld [vmem:[%s6051_s1 + $0x18] sm:$0xff] }
 0x3d3   :  { %3540 = vmatprep.subr.mxu1 %v3387_v9  ;;  %v4117_v62 = vsel %vm1725_vm7, %v4102_v39, %v4104_v34 }
 0x3d5   :  { %4886 = vmatmul.mubr.msk.f32.vlgmr.msra.gmra.mrb[2].mxu1 %vm65_vm1, %v4884_v49  ;;  %v3628_v60 = vpop.permute.xlu1 %3627 }
 0x3d6   :  { %3541 = vmatpush1.msra.mxu1 %v3388_v28  ;;  %3604 = vmatprep.mubr.f32.mxu1 %v5076_v2  ;;  %v3634_v33 = vsel %vm1239_vm5, %v3628_v60, %v3618_v55  ;;  %v3629_v35 = vsel %vm1239_vm5, %v3626_v47, %v3628_v60  ;;  %v4110_v45 = vpop.permute.xlu0 %4109 }
 0x3d7   :  { %3640 = vmatprep.subr.mxu1 %v3632_v59 }
 0x3d9   :  { %4887 = vmatmul.mubr.msk.f32.vlgmr.msra.gmra.mrb[4].mxu1 %vm65_vm1, %v4884_v49  ;;  %v3864_v50 = vpop.permute.xlu1 %3863 }
 0x3da   :  { %3641 = vmatpush1.msra.mxu1 %v3633_v58  ;;  %3704 = vmatprep.mubr.f32.mxu1 %v5076_v2  ;;  %v3874_v37 = vsel %vm1482_vm6, %v3862_v52, %v3864_v50  ;;  %v4346_v12 = vpop.permute.xlu0 %4345  ;;  %v5068_v58 = vld [vmem:[%s6051_s1 + $0x20] sm:$0xff] }
 0x3db   :  { %3711 = vmatprep.subr.mxu1 %v3630_v29 }
 0x3dd   :  { %4889 = vmatmul.mubr.msk.f32.vlgmr.msra.gmra.mrb[0].mxu1 %vm65_vm1, %v4888_v30  ;;  %v3866_v32 = vpop.permute.xlu1 %3865 }
 0x3de   :  { %3712 = vmatpush1.msra.mxu1 %v3631_v31  ;;  %3775 = vmatprep.mubr.f32.mxu1 %v5076_v2  ;;  %v3872_v40 = vsel %vm1482_vm6, %v3866_v32, %v3868_v5  ;;  %v3873_v43 = vsel %vm1482_vm6, %v3864_v50, %v3866_v32  ;;  %v4344_v17 = vpop.permute.xlu0 %4343 }
 0x3df   :  { %3782 = vmatprep.subr.mxu1 %v3634_v33  ;;  %v4359_v20 = vsel %vm1968_vm8, %v4344_v17, %v4346_v12 }
 0x3e1   :  { %4890 = vmatmul.mubr.msk.f32.vlgmr.msra.gmra.mrb[2].mxu1 %vm65_vm1, %v4888_v30  ;;  %v3870_v36 = vpop.permute.xlu1 %3869 }
 0x3e2   :  { %3783 = vmatpush1.msra.mxu1 %v3629_v35  ;;  %3846 = vmatprep.mubr.f32.mxu1 %v5076_v2  ;;  %v3876_v44 = vsel %vm1482_vm6, %v3870_v36, %v3860_v48  ;;  %v3871_v7 = vsel %vm1482_vm6, %v3868_v5, %v3870_v36  ;;  %v4352_v54 = vpop.permute.xlu0 %4351 }
 0x3e3   :  { %3882 = vmatprep.subr.mxu1 %v3874_v37 }
 0x3e5   :  { %4891 = vmatmul.mubr.msk.f32.vlgmr.msra.gmra.mrb[4].mxu1 %vm65_vm1, %v4888_v30  ;;  %v4106_v42 = vpop.permute.xlu1 %4105  ;;  %v5069_v30 = vld [vmem:[%s6051_s1 + $0x28] sm:$0xff] }
 0x3e6   :  { %3883 = vmatpush1.msra.mxu1 %v3875_v38  ;;  %3946 = vmatprep.mubr.f32.mxu1 %v5076_v2  ;;  %v4116_v10 = vsel %vm1725_vm7, %v4104_v34, %v4106_v42 }
 0x3e7   :  { %3953 = vmatprep.subr.mxu1 %v3872_v40 }
 0x3e9   :  { %4893 = vmatmul.mubr.msk.f32.vlgmr.msra.gmra.mrb[0].mxu1 %vm65_vm1, %v4892_v41  ;;  %v4108_v6 = vpop.permute.xlu1 %4107 }
 0x3ea   :  { %3954 = vmatpush1.msra.mxu1 %v3873_v43  ;;  %4017 = vmatprep.mubr.f32.mxu1 %v5076_v2  ;;  %v4114_v14 = vsel %vm1725_vm7, %v4108_v6, %v4110_v45  ;;  %v4115_v15 = vsel %vm1725_vm7, %v4106_v42, %v4108_v6 }
 0x3eb   :  { %4024 = vmatprep.subr.mxu1 %v3876_v44 }
 0x3ed   :  { %4894 = vmatmul.mubr.msk.f32.vlgmr.msra.gmra.mrb[2].mxu1 %vm65_vm1, %v4892_v41  ;;  %v4112_v11 = vpop.permute.xlu1 %4111 }
 0x3ee   :  { %4025 = vmatpush1.msra.mxu1 %v3871_v7  ;;  %4088 = vmatprep.mubr.f32.mxu1 %v5076_v2  ;;  %v4118_v0 = vsel %vm1725_vm7, %v4112_v11, %v4102_v39  ;;  %v4113_v16 = vsel %vm1725_vm7, %v4110_v45, %v4112_v11  ;;  %v4615_v45 = vld [vmem:[%s6055_s6] sm:$0xff] }
 0x3ef   :  { %4124 = vmatprep.subr.mxu1 %v4116_v10  ;;  %v4619_v10 = vld [vmem:[%s6056_s7] sm:$0xff] }
 0x3f1   :  { %4895 = vmatmul.mubr.msk.f32.vlgmr.msra.gmra.mrb[4].mxu1 %vm65_vm1, %v4892_v41  ;;  %v4348_v19 = vpop.permute.xlu1 %4347 }
 0x3f2   :  { %4125 = vmatpush1.msra.mxu1 %v4117_v62  ;;  %4188 = vmatprep.mubr.f32.mxu1 %v5076_v2  ;;  %v4358_v1 = vsel %vm1968_vm8, %v4346_v12, %v4348_v19 }
 0x3f3   :  { %4195 = vmatprep.subr.mxu1 %v4114_v14 }
 0x3f5   :  { %4897 = vmatmul.mubr.msk.f32.vlgmr.msra.gmra.mrb[0].mxu1 %vm65_vm1, %v4896_v63  ;;  %v4350_v18 = vpop.permute.xlu1 %4349 }
 0x3f6   :  { %4196 = vmatpush1.msra.mxu1 %v4115_v15  ;;  %4259 = vmatprep.mubr.f32.mxu1 %v5076_v2  ;;  %v4356_v21 = vsel %vm1968_vm8, %v4350_v18, %v4352_v54  ;;  %v4357_v3 = vsel %vm1968_vm8, %v4348_v19, %v4350_v18 }
 0x3f7   :  { %4266 = vmatprep.subr.mxu1 %v4118_v0 }
 0x3f9   :  { %4898 = vmatmul.mubr.msk.f32.vlgmr.msra.gmra.mrb[2].mxu1 %vm65_vm1, %v4896_v63  ;;  %v4354_v55 = vpop.permute.xlu1 %4353 }
 0x3fa   :  { %4267 = vmatpush1.msra.mxu1 %v4113_v16  ;;  %4330 = vmatprep.mubr.f32.mxu1 %v5076_v2  ;;  %v4360_v22 = vsel %vm1968_vm8, %v4354_v55, %v4344_v17  ;;  %v4355_v23 = vsel %vm1968_vm8, %v4352_v54, %v4354_v55 }
 0x3fb   :  { %4366 = vmatprep.subr.mxu1 %v4358_v1 }
 0x3fd   :  { %4899 = vmatmul.mubr.msk.f32.vlgmr.msra.gmra.mrb[4].mxu1 %vm65_vm1, %v4896_v63 }
 0x3fe   :  { %4367 = vmatpush1.msra.mxu1 %v4359_v20  ;;  %4430 = vmatprep.mubr.f32.mxu1 %v5076_v2 }
 0x3ff   :  { %4437 = vmatprep.subr.mxu1 %v4356_v21 }
 0x401   :  { %4901 = vmatmul.mubr.msk.f32.vlgmr.msra.gmra.mrb[0].mxu1 %vm65_vm1, %v4900_v46 }
 0x402   :  { %4438 = vmatpush1.msra.mxu1 %v4357_v3  ;;  %4501 = vmatprep.mubr.f32.mxu1 %v5076_v2  ;;  %v5070_v3 = vld [vmem:[%s6049_s0] sm:$0xff] }
 0x403   :  { %4508 = vmatprep.subr.mxu1 %v4360_v22 }
 0x405   :  { %4902 = vmatmul.mubr.msk.f32.vlgmr.msra.gmra.mrb[2].mxu1 %vm65_vm1, %v4900_v46 }
 0x406   :  { %4509 = vmatpush1.msra.mxu1 %v4355_v23  ;;  %4572 = vmatprep.mubr.f32.mxu1 %v5076_v2  ;;  %v5066_v2 = vld [vmem:[%s6051_s1 + $0x10] sm:$0xff]  ;;  %v5071_v23 = vld [vmem:[%s6049_s0 + $0x8] sm:$0xff] }
 0x409   :  { %4903 = vmatmul.mubr.msk.f32.vlgmr.msra.gmra.mrb[4].mxu1 %vm65_vm1, %v4900_v46 }
 0x4d4   :  { %v4432_v57 = vpop.f32.mrb[0].mxu1 }
 0x4d5   :  { %v4585_v24 = vmul.f32 %v5064_v13, %v4432_v57  ;;  %v4434_v47 = vpop.f32.mrb[1].mxu1  ;;  %v5072_v13 = vld [vmem:[%s6049_s0 + $0x10] sm:$0xff] }
 0x4d6   :  { %v4586_v8 = vmul.f32 %v5065_v51, %v4434_v47 }
 0x4d7   :  { %v4598_v61 = vmul.f32 %v4585_v24, %v4432_v57 }
 0x4d8   :  { %v4591_v56 = vadd.f32 %v4586_v8, %v4585_v24  ;;  %v4599_v4 = vmul.f32 %v4586_v8, %v4434_v47  ;;  %v4503_v52 = vpop.f32.mrb[2].mxu1  ;;  %v5074_v8 = vld [vmem:[%s6049_s0 + $0x20] sm:$0xff] }
 0x4d9   :  { %v4587_v25 = vmul.f32 %v5066_v2, %v4503_v52  ;;  %v4505_v26 = vpop.f32.mrb[3].mxu1 }
 0x4da   :  { %v4604_v49 = vadd.f32 %v4599_v4, %v4598_v61  ;;  %v4588_v53 = vmul.f32 %v5067_v27, %v4505_v26 }
 0x4db   :  { %v4592_v9 = vadd.f32 %v4591_v56, %v4587_v25  ;;  %v4600_v48 = vmul.f32 %v4587_v25, %v4503_v52  ;;  %v5075_v56 = vld [vmem:[%s6049_s0 + $0x28] sm:$0xff] }
 0x4dc   :  { %v4601_v28 = vmul.f32 %v4588_v53, %v4505_v26  ;;  %v4574_v60 = vpop.f32.mrb[4].mxu1 }
 0x4dd   :  { %v4605_v59 = vadd.f32 %v4604_v49, %v4600_v48  ;;  %v4589_v5 = vmul.f32 %v5068_v58, %v4574_v60  ;;  %v4576_v50 = vpop.f32.mrb[5].mxu1  ;;  %v4593_v29 = vadd.f32 %v4592_v9, %v4588_v53 }
 0x4de   :  { %v4590_v31 = vmul.f32 %v5069_v30, %v4576_v50 }
 0x4df   :  { %v4606_v32 = vadd.f32 %v4605_v59, %v4601_v28  ;;  %v4602_v33 = vmul.f32 %v4589_v5, %v4574_v60  ;;  %v4594_v34 = vadd.f32 %v4593_v29, %v4589_v5 }
 0x4e0   :  { %v4603_v35 = vmul.f32 %v4590_v31, %v4576_v50 }
 0x4e1   :  { %v4607_v36 = vadd.f32 %v4606_v32, %v4602_v33  ;;  %v4595_v37 = vadd.f32 %v4594_v34, %v4590_v31 }
 0x4e3   :  { %v4608_v38 = vadd.f32 %v4607_v36, %v4603_v35  ;;  %4596 = vadd.xlane.f32.xlu0 %v4595_v37 }
 0x4e5   :  { %4609 = vadd.xlane.f32.xlu1 %v4608_v38 }
 0x570   :  { %v4597_v39 = vpop.xlane.xlu0 %4596 }
 0x571   :  { %v4611_v42 = vmul.f32 0.001953125, %v4597_v39 }
 0x572   :  { %v4610_v40 = vpop.xlane.xlu1 %4609 }
 0x573   :  { %v4613_v41 = vmul.f32 %v4611_v42, %v4611_v42  ;;  %v4612_v43 = vmul.f32 0.001953125, %v4610_v40 }
 0x575   :  { %v4614_v6 = vsub.f32 %v4612_v43, %v4613_v41 }
 0x577   :  { %v4616_v44 = vadd.f32 1e-05, %v4614_v6 }
 0x579   :  { %5038 = vrsqrt.f32 %v4616_v44 }
 0x583   :  { %v5039_v7 = vpop.eup %5038 }
 0x584   :  { %v4618_v11 = vmul.f32 %v5039_v7, %v4615_v45 }
 0x586   :  { %4624 = vperm.xlu0 %5010, %v4618_v11   ;;  %v4620_v62 = vmul.f32 %v4618_v11, %v4611_v42 }
 0x588   :  { %v4621_v12 = vsub.f32 %v4619_v10, %v4620_v62 }
 0x58a   :  { %4635 = vperm.xlu1 %5011, %v4621_v12  }
 0x605   :  { %v4625_v14 = vpop.permute.xlu0 %4624 }
 0x606   :  { %v4627_v63 = vmul.f32 %v4625_v14, %v4432_v57  ;;  %v4628_v19 = vmul.f32 %v4625_v14, %v4434_v47  ;;  %v4629_v15 = vmul.f32 %v4625_v14, %v4503_v52  ;;  %v4630_v0 = vmul.f32 %v4625_v14, %v4505_v26  ;;  %v5073_v47 = vld [vmem:[%s6049_s0 + $0x18] sm:$0xff] }
 0x607   :  { %v4631_v17 = vmul.f32 %v4625_v14, %v4574_v60  ;;  %v4632_v16 = vmul.f32 %v4625_v14, %v4576_v50 }
 0x609   :  { %v4636_v18 = vpop.permute.xlu1 %4635 }
 0x60a   :  { %v4638_v1 = vadd.f32 %v4636_v18, %v4627_v63  ;;  %v4639_v20 = vadd.f32 %v4636_v18, %v4628_v19  ;;  %v4640_v54 = vadd.f32 %v4636_v18, %v4629_v15  ;;  %v4641_v21 = vadd.f32 %v4636_v18, %v4630_v0 }
 0x60b   :  { %v4642_v46 = vadd.f32 %v4636_v18, %v4631_v17  ;;  %v4643_v55 = vadd.f32 %v4636_v18, %v4632_v16 }
 0x60c   :  { %v5926_v22 = vadd.f32 %v5070_v3, %v4638_v1  ;;  %v5931_v57 = vadd.f32 %v5071_v23, %v4639_v20  ;;  %v5936_v24 = vadd.f32 %v5072_v13, %v4640_v54  ;;  %v5941_v51 = vadd.f32 %v5073_v47, %v4641_v21 }
 0x60d   :  { %v5946_v61 = vadd.f32 %v5074_v8, %v4642_v46  ;;  %v5951_v4 = vadd.f32 %v5075_v56, %v4643_v55 }
 0x60e   :  { %v5954_v52 = vmul.f32 0.70710677, %v5926_v22  ;;  %v5957_v2 = vmul.f32 0.70710677, %v5931_v57  ;;  %v5960_v25 = vmul.f32 0.70710677, %v5936_v24 }
 0x60f   :  { %v5963_v26 = vmul.f32 0.70710677, %v5941_v51  ;;  %v5966_v49 = vmul.f32 0.70710677, %v5946_v61  ;;  %v5969_v27 = vmul.f32 0.70710677, %v5951_v4 }
 0x610   :  { %v4662_v53 = vand.u32 2147483647, %v5954_v52  ;;  %v4663_v9 = vand.u32 2147483647, %v5957_v2  ;;  %v4664_v48 = vand.u32 2147483647, %v5960_v25 }
 0x611   :  { %v4665_v28 = vand.u32 2147483647, %v5963_v26  ;;  %v4666_v60 = vand.u32 2147483647, %v5966_v49  ;;  %v4667_v59 = vand.u32 2147483647, %v5969_v27 }
 0x612   :  { %v4668_v58 = vmul.f32 0.3275911, %v4662_v53  ;;  %v4669_v5 = vmul.f32 0.3275911, %v4663_v9  ;;  %v4670_v50 = vmul.f32 0.3275911, %v4664_v48 }
 0x613   :  { %v4671_v29 = vmul.f32 0.3275911, %v4665_v28  ;;  %v4672_v30 = vmul.f32 0.3275911, %v4666_v60  ;;  %v4673_v31 = vmul.f32 0.3275911, %v4667_v59 }
 0x614   :  { %v4674_v32 = vadd.f32 1.0, %v4668_v58  ;;  %v4675_v33 = vadd.f32 1.0, %v4669_v5  ;;  %v4676_v34 = vadd.f32 1.0, %v4670_v50  ;;  %v4758_v38 = vsub.f32 0.0, %v4662_v53 }
 0x615   :  { %v4677_v35 = vadd.f32 1.0, %v4671_v29  ;;  %v4678_v36 = vadd.f32 1.0, %v4672_v30  ;;  %v4679_v37 = vadd.f32 1.0, %v4673_v31  ;;  %v4759_v42 = vsub.f32 0.0, %v4663_v9 }
 0x616   :  { %5040 = vrcp.f32 %v4674_v32  ;;  %v4760_v40 = vsub.f32 0.0, %v4664_v48  ;;  %v4761_v6 = vsub.f32 0.0, %v4665_v28  ;;  %v4762_v7 = vsub.f32 0.0, %v4666_v60 }
 0x617   :  { %5042 = vrcp.f32 %v4675_v33  ;;  %v4763_v12 = vsub.f32 0.0, %v4667_v59  ;;  %v4764_v14 = vmul.f32 %v4758_v38, %v4662_v53  ;;  %v4765_v0 = vmul.f32 %v4759_v42, %v4663_v9 }
 0x618   :  { %5044 = vrcp.f32 %v4676_v34  ;;  %v4766_v17 = vmul.f32 %v4760_v40, %v4664_v48  ;;  %v4767_v54 = vmul.f32 %v4761_v6, %v4665_v28  ;;  %v4768_v3 = vmul.f32 %v4762_v7, %v4666_v60 }
 0x619   :  { %5046 = vrcp.f32 %v4677_v35  ;;  %v4769_v8 = vmul.f32 %v4763_v12, %v4667_v59  ;;  %v4770_v48 = vmul.f32 1.442695, %v4764_v14  ;;  %v4772_v50 = vmul.f32 1.442695, %v4765_v0 }
 0x61a   :  { %5048 = vrcp.f32 %v4678_v36  ;;  %v4774_v31 = vmul.f32 1.442695, %v4766_v17  ;;  %v4778_v38 = vmul.f32 1.442695, %v4768_v3  ;;  %vm4794_vm15 = vcmp.ge.f32.partialorder %v5954_v52, 0.0 }
 0x61b   :  { %5050 = vrcp.f32 %v4679_v37  ;;  %vm4795_vm0 = vcmp.ge.f32.partialorder %v5957_v2, 0.0  ;;  %vm4796_vm1 = vcmp.ge.f32.partialorder %v5960_v25, 0.0  ;;  %vm4797_vm2 = vcmp.ge.f32.partialorder %v5963_v26, 0.0 }
 0x61c   :  { %5052 = vpow2.f32 %v4770_v48  ;;  %vm4798_vm3 = vcmp.ge.f32.partialorder %v5966_v49, 0.0  ;;  %vm4799_vm4 = vcmp.ge.f32.partialorder %v5969_v27, 0.0  ;;  %v4655_v49 = vmul.f32 0.5, %v5951_v4 }
 0x61d   :  { %5054 = vpow2.f32 %v4772_v50 }
 0x61e   :  { %5056 = vpow2.f32 %v4774_v31 }
 0x620   :  { %v5041_v39 = vpop.eup %5040 }
 0x621   :  { %v5043_v41 = vpop.eup %5042  ;;  %v4686_v43 = vmul.f32 %v5041_v39, %v4674_v32 }
 0x622   :  { %v5045_v44 = vpop.eup %5044  ;;  %v4687_v45 = vmul.f32 %v5043_v41, %v4675_v33 }
 0x623   :  { %v5047_v11 = vpop.eup %5046  ;;  %v4688_v10 = vmul.f32 %v5045_v44, %v4676_v34  ;;  %v4692_v62 = vsub.f32 2.0, %v4686_v43  ;;  %v4776_v34 = vmul.f32 1.442695, %v4767_v54 }
 0x624   :  { %v5049_v63 = vpop.eup %5048  ;;  %v4689_v19 = vmul.f32 %v5047_v11, %v4677_v35  ;;  %v4693_v15 = vsub.f32 2.0, %v4687_v45 }
 0x625   :  { %v5051_v16 = vpop.eup %5050  ;;  %v4690_v18 = vmul.f32 %v5049_v63, %v4678_v36  ;;  %v4694_v1 = vsub.f32 2.0, %v4688_v10  ;;  %v5977_v20 = vmul.f32 %v5041_v39, %v4692_v62  ;;  %5058 = vpow2.f32 %v4776_v34 }
 0x626   :  { %v4691_v21 = vmul.f32 %v5051_v16, %v4679_v37  ;;  %v4695_v46 = vsub.f32 2.0, %v4689_v19  ;;  %v5979_v55 = vmul.f32 %v5043_v41, %v4693_v15  ;;  %v4780_v41 = vmul.f32 1.442695, %v4769_v8  ;;  %v5053_v50 = vpop.eup %5052 }
 0x627   :  { %v4696_v23 = vsub.f32 2.0, %v4690_v18  ;;  %v5981_v13 = vmul.f32 %v5045_v44, %v4694_v1  ;;  %v4704_v47 = vmul.f32 1.0614054, %v5977_v20  ;;  %5060 = vpow2.f32 %v4778_v38 }
 0x628   :  { %v4697_v56 = vsub.f32 2.0, %v4691_v21  ;;  %v5984_v53 = vmul.f32 %v5047_v11, %v4695_v46  ;;  %v4705_v9 = vmul.f32 1.0614054, %v5979_v55  ;;  %5062 = vpow2.f32 %v4780_v41 }
 0x629   :  { %v5987_v58 = vmul.f32 %v5049_v63, %v4696_v23  ;;  %v4706_v28 = vmul.f32 1.0614054, %v5981_v13  ;;  %v4710_v5 = vadd.f32 -1.4531521, %v4704_v47  ;;  %v4652_v38 = vmul.f32 0.5, %v5936_v24 }
 0x62a   :  { %v5990_v29 = vmul.f32 %v5051_v16, %v4697_v56  ;;  %v4707_v60 = vmul.f32 1.0614054, %v5984_v53  ;;  %v4711_v30 = vadd.f32 -1.4531521, %v4705_v9 }
 0x62b   :  { %v4708_v59 = vmul.f32 1.0614054, %v5987_v58  ;;  %v4712_v32 = vadd.f32 -1.4531521, %v4706_v28  ;;  %v4716_v33 = vmul.f32 %v4710_v5, %v5977_v20 }
 0x62c   :  { %v4709_v35 = vmul.f32 1.0614054, %v5990_v29  ;;  %v4713_v36 = vadd.f32 -1.4531521, %v4707_v60  ;;  %v4717_v37 = vmul.f32 %v4711_v30, %v5979_v55  ;;  %v4650_v60 = vmul.f32 0.5, %v5926_v22 }
 0x62d   :  { %v4714_v39 = vadd.f32 -1.4531521, %v4708_v59  ;;  %v4718_v42 = vmul.f32 %v4712_v32, %v5981_v13  ;;  %v4722_v40 = vadd.f32 1.4214138, %v4716_v33  ;;  %v5055_v32 = vpop.eup %5054  ;;  %v4651_v33 = vmul.f32 0.5, %v5931_v57 }
 0x62e   :  { %v4715_v43 = vadd.f32 -1.4531521, %v4709_v35  ;;  %v4719_v6 = vmul.f32 %v4713_v36, %v5984_v53  ;;  %v4723_v44 = vadd.f32 1.4214138, %v4717_v37  ;;  %v5057_v37 = vpop.eup %5056 }
 0x62f   :  { %v4720_v45 = vmul.f32 %v4714_v39, %v5987_v58  ;;  %v4724_v7 = vadd.f32 1.4214138, %v4718_v42  ;;  %v4728_v11 = vmul.f32 %v4722_v40, %v5977_v20  ;;  %v5059_v22 = vpop.eup %5058  ;;  %v4653_v40 = vmul.f32 0.5, %v5941_v51 }
 0x630   :  { %v4721_v10 = vmul.f32 %v4715_v43, %v5990_v29  ;;  %v4725_v62 = vadd.f32 1.4214138, %v4719_v6  ;;  %v4729_v12 = vmul.f32 %v4723_v44, %v5979_v55 }
 0x631   :  { %v4726_v14 = vadd.f32 1.4214138, %v4720_v45  ;;  %v4730_v63 = vmul.f32 %v4724_v7, %v5981_v13  ;;  %v4734_v19 = vadd.f32 -0.28449672, %v4728_v11  ;;  %v5061_v6 = vpop.eup %5060 }
 0x632   :  { %v4727_v15 = vadd.f32 1.4214138, %v4721_v10  ;;  %v4731_v0 = vmul.f32 %v4725_v62, %v5984_v53  ;;  %v4735_v17 = vadd.f32 -0.28449672, %v4729_v12  ;;  %v5063_v45 = vpop.eup %5062 }
 0x633   :  { %v4732_v16 = vmul.f32 %v4726_v14, %v5987_v58  ;;  %v4736_v18 = vadd.f32 -0.28449672, %v4730_v63  ;;  %v4740_v1 = vmul.f32 %v4734_v19, %v5977_v20 }
 0x634   :  { %v4733_v54 = vmul.f32 %v4727_v15, %v5990_v29  ;;  %v4737_v21 = vadd.f32 -0.28449672, %v4731_v0  ;;  %v4741_v46 = vmul.f32 %v4735_v17, %v5979_v55 }
 0x635   :  { %v4738_v3 = vadd.f32 -0.28449672, %v4732_v16  ;;  %v4742_v23 = vmul.f32 %v4736_v18, %v5981_v13  ;;  %v4746_v47 = vadd.f32 0.2548296, %v4740_v1 }
 0x636   :  { %v4739_v8 = vadd.f32 -0.28449672, %v4733_v54  ;;  %v4743_v56 = vmul.f32 %v4737_v21, %v5984_v53  ;;  %v4747_v9 = vadd.f32 0.2548296, %v4741_v46  ;;  %v4654_v54 = vmul.f32 0.5, %v5946_v61 }
 0x637   :  { %v4744_v48 = vmul.f32 %v4738_v3, %v5987_v58  ;;  %v4748_v28 = vadd.f32 0.2548296, %v4742_v23  ;;  %v4752_v5 = vmul.f32 %v4746_v47, %v5977_v20 }
 0x638   :  { %v4745_v30 = vmul.f32 %v4739_v8, %v5990_v29  ;;  %v4749_v31 = vadd.f32 0.2548296, %v4743_v56  ;;  %v4753_v59 = vmul.f32 %v4747_v9, %v5979_v55 }
 0x639   :  { %v4750_v34 = vadd.f32 0.2548296, %v4744_v48  ;;  %v4754_v35 = vmul.f32 %v4748_v28, %v5981_v13  ;;  %v4782_v36 = vmul.f32 %v5053_v50, %v4752_v5 }
 0x63a   :  { %v4751_v39 = vadd.f32 0.2548296, %v4745_v30  ;;  %v4755_v20 = vmul.f32 %v4749_v31, %v5984_v53  ;;  %v4783_v42 = vmul.f32 %v5055_v32, %v4753_v59 }
 0x63b   :  { %v4756_v41 = vmul.f32 %v4750_v34, %v5987_v58  ;;  %v4784_v55 = vmul.f32 %v5057_v37, %v4754_v35  ;;  %v4788_v43 = vsub.f32 1.0, %v4782_v36 }
 0x63c   :  { %v4757_v57 = vmul.f32 %v4751_v39, %v5990_v29  ;;  %v4785_v44 = vmul.f32 %v5059_v22, %v4755_v20  ;;  %v4789_v13 = vsub.f32 1.0, %v4783_v42 }
 0x63d   :  { %v4786_v24 = vmul.f32 %v5061_v6, %v4756_v41  ;;  %v4790_v7 = vsub.f32 1.0, %v4784_v55  ;;  %v4800_v53 = vsub.f32 0.0, %v4788_v43 }
 0x63e   :  { %v4787_v11 = vmul.f32 %v5063_v45, %v4757_v57  ;;  %v4791_v10 = vsub.f32 1.0, %v4785_v44  ;;  %v4801_v51 = vsub.f32 0.0, %v4789_v13 }
 0x63f   :  { %v4792_v58 = vsub.f32 1.0, %v4786_v24  ;;  %v4802_v62 = vsub.f32 0.0, %v4790_v7  ;;  %v4806_v29 = vsel %vm4794_vm15, %v4788_v43, %v4800_v53 }
 0x640   :  { %v4793_v12 = vsub.f32 1.0, %v4787_v11  ;;  %v4803_v14 = vsub.f32 0.0, %v4791_v10  ;;  %v4807_v63 = vsel %vm4795_vm0, %v4789_v13, %v4801_v51  ;;  %v4812_v52 = vadd.f32 1.0, %v4806_v29 }
 0x641   :  { %v4804_v19 = vsub.f32 0.0, %v4792_v58  ;;  %v4808_v15 = vsel %vm4796_vm1, %v4790_v7, %v4802_v62  ;;  %v4813_v2 = vadd.f32 1.0, %v4807_v63 }
 0x642   :  { %v4805_v0 = vsub.f32 0.0, %v4793_v12  ;;  %v4809_v17 = vsel %vm4797_vm2, %v4791_v10, %v4803_v14  ;;  %v4814_v16 = vadd.f32 1.0, %v4808_v15  ;;  %v4818_v18 = vmul.f32 %v4812_v52, %v4650_v60 }
 0x643   :  { %v4810_v25 = vsel %vm4798_vm3, %v4792_v58, %v4804_v19  ;;  %v4815_v1 = vadd.f32 1.0, %v4809_v17  ;;  %v4819_v26 = vmul.f32 %v4813_v2, %v4651_v33 }
 0x644   :  { %v4811_v21 = vsel %vm4799_vm4, %v4793_v12, %v4805_v0  ;;  %v4816_v46 = vadd.f32 1.0, %v4810_v25  ;;  %v4820_v3 = vmul.f32 %v4814_v16, %v4652_v38  ;;  %4824 = vst [vmem:[%s6057_s8] sm:$0xff] %v4818_v18 }
 0x645   :  { %v4817_v23 = vadd.f32 1.0, %v4811_v21  ;;  %v4821_v47 = vmul.f32 %v4815_v1, %v4653_v40  ;;  %4825 = vst [vmem:[%s6057_s8 + $0x8] sm:$0xff] %v4819_v26 }
 0x646   :  { %v4822_v27 = vmul.f32 %v4816_v46, %v4654_v54  ;;  %4826 = vst [vmem:[%s6057_s8 + $0x10] sm:$0xff] %v4820_v3 }
 0x647   :  { %v4823_v61 = vmul.f32 %v4817_v23, %v4655_v49  ;;  %4827 = vst [vmem:[%s6057_s8 + $0x18] sm:$0xff] %v4821_v47 }
 0x648   :  { %4828 = vst [vmem:[%s6057_s8 + $0x20] sm:$0xff] %v4822_v27 }
 0x649   :  { %4829 = vst [vmem:[%s6057_s8 + $0x28] sm:$0xff] %v4823_v61 }

</bundles_post_ra>
